<compile_context>
chip_gen: v7x
topology: tpu7x:2x2x1
jax: 0.10.0
libtpu: 0.0.40
codegen_flags: <defaults>
</compile_context>

<pallas_src>
import functools

import jax
import jax.numpy as jnp
import numpy as np
from jax.experimental import pallas as pl
from jax.experimental.pallas import tpu as pltpu

BN_EPS = 1e-5


def _round_up(v, m):
    return ((v + m - 1) // m) * m


def _silu(v):
    # SiLU = v * sigmoid(v); the divide goes to the EUP via approx reciprocal.
    return v * pl.reciprocal(1.0 + jnp.exp(-v), approx=True)


def _dwconv_kernel(x_ref, wdw_ref, b1_ref, wpw_ref, s2_ref, b2_ref,
                   o_ref, acc_ref, *, ksize, stride, h_out, w_out):
    ci = pl.program_id(1)
    n_ci = pl.num_programs(1)

    @pl.when(ci == 0)
    def _init():
        acc_ref[...] = jnp.zeros_like(acc_ref)

    x = x_ref[0]                          # (Hp, Wp, CT) f32, pre-padded, channels on lanes
    Hp, Wp, CT = x.shape
    # Wp % 8 == 0 (padded in the wrapper), so this reshape is layout-free and
    # the dx shift becomes a pure sublane rotate on the XLU.
    x_flat = x.reshape(Hp * Wp, CT)

    w_dw = wdw_ref[...]                   # (K, K, CT), bn1 scale already folded in

    acc_dw = jnp.zeros((h_out, w_out, CT), jnp.float32)
    for dx in range(ksize):
        if dx == 0:
            shifted = x
        else:
            rolled = pltpu.roll(x_flat, Hp * Wp - dx, axis=0)  # out[r] = x_flat[r + dx]
            shifted = rolled.reshape(Hp, Wp, CT)
        # Aligned column slice (starts at 0) — no sublane-shift relayout.
        if stride == 1:
            strip = jax.lax.slice(shifted, (0, 0, 0), (Hp, w_out, CT))
        else:
            # TODO(synk): for stride=2 layers a space-to-depth pre-pass in the
            # wrapper would avoid this strided sublane slice.
            strip = jax.lax.slice(shifted, (0, 0, 0),
                                  (Hp, (w_out - 1) * stride + 1, CT),
                                  (1, stride, 1))
        for dy in range(ksize):
            if stride == 1:
                tap = jax.lax.slice(strip, (dy, 0, 0), (dy + h_out, w_out, CT))
            else:
                tap = jax.lax.slice(strip, (dy, 0, 0),
                                    (dy + (h_out - 1) * stride + 1, w_out, CT),
                                    (stride, 1, 1))
            acc_dw = acc_dw + w_dw[dy, dx][None, None, :] * tap

    # BN1 bias (scale folded into the weights) + SiLU.
    y = _silu(acc_dw + b1_ref[0][None, None, :])

    # Pointwise 1x1 conv = bf16 MXU matmul, f32 accumulation over C tiles.
    y2 = y.reshape(h_out * w_out, CT).astype(jnp.bfloat16)
    acc_ref[...] += jnp.dot(y2, wpw_ref[...],
                            preferred_element_type=jnp.float32)

    @pl.when(ci == n_ci - 1)
    def _finalize():
        z = acc_ref[...] * s2_ref[0][None, :] + b2_ref[0][None, :]
        z = _silu(z)
        o_ref[0] = z.reshape(h_out, w_out, -1).astype(o_ref.dtype)


def _vmem_limit_bytes():
    # ~96 MiB on v5e/v6e (128 MiB physical), ~48 MiB on v7x (64 MiB physical).
    try:
        cap = int(pltpu.get_tpu_info().vmem_capacity_bytes)
    except Exception:
        cap = 64 * 1024 * 1024
    return int(min(96 * 1024 * 1024, (cap * 3) // 4))


@functools.partial(jax.jit, static_argnames=("ksize", "stride"))
def dwconv_forward(x, w_dw, bn1_scale, bn1_bias, w_pw, bn2_scale, bn2_bias,
                   *, ksize, stride):
    """x: (N, C, H, W) f32.  w_dw: (C, 1, K, K).  w_pw: (Cout, C, 1, 1).
    bn*_scale / bn*_bias: folded BatchNorm scale/bias vectors."""
    N, C, H, W = x.shape
    c_out = w_pw.shape[0]
    pad = (ksize - 1) // 2
    h_out = (H + 2 * pad - ksize) // stride + 1
    w_out = (W + 2 * pad - ksize) // stride + 1

    # Pre-padded NHWC input: conv padding + W rounded to a multiple of 8
    # (sublane alignment) + channels padded to a multiple of 128 (lane-dense).
    Hp = H + 2 * pad
    Wp = _round_up(W + 2 * pad, 8)
    c_pad = _round_up(C, 128)
    c_out_pad = _round_up(c_out, 128)

    x_nhwc = jnp.transpose(x, (0, 2, 3, 1)).astype(jnp.float32)
    x_nhwc = jnp.pad(x_nhwc, ((0, 0), (pad, pad),
                              (pad, Wp - W - pad), (0, c_pad - C)))

    # Depthwise weights with bn1 scale folded in (exact per-channel fold, f32).
    s1 = bn1_scale.astype(jnp.float32)
    wdw = jnp.transpose(w_dw[:, 0], (1, 2, 0)).astype(jnp.float32)          # (K, K, C)
    wdw = jnp.pad(wdw * s1[None, None, :], ((0, 0), (0, 0), (0, c_pad - C)))
    b1 = jnp.pad(bn1_bias.astype(jnp.float32), (0, c_pad - C)).reshape(1, c_pad)

    # Pointwise weights as (C_pad, Cout_pad) bf16 for the MXU; padded rows/cols are 0.
    wpw = jnp.transpose(w_pw[:, :, 0, 0], (1, 0)).astype(jnp.float32)       # (C, Cout)
    wpw = jnp.pad(wpw, ((0, c_pad - C), (0, c_out_pad - c_out))).astype(jnp.bfloat16)
    s2 = jnp.pad(bn2_scale.astype(jnp.float32), (0, c_out_pad - c_out)).reshape(1, c_out_pad)
    b2 = jnp.pad(bn2_bias.astype(jnp.float32), (0, c_out_pad - c_out)).reshape(1, c_out_pad)

    # 256-deep K tiles fill the v6e/v7x MXU; fall back to 128.
    c_tile = 256 if c_pad % 256 == 0 else 128
    n_ci = c_pad // c_tile

    kernel = functools.partial(_dwconv_kernel, ksize=ksize, stride=stride,
                               h_out=h_out, w_out=w_out)

    flops = int(N * h_out * w_out * (C * ksize * ksize * 2 + C * c_out * 2))
    transcendentals = int(N * h_out * w_out * (C + c_out))
    bytes_accessed = int(x_nhwc.size * 4 + wdw.size * 4 + wpw.size * 2
                         + N * h_out * w_out * c_out_pad * 4)

    out_nhwc = pl.pallas_call(
        kernel,
        out_shape=jax.ShapeDtypeStruct((N, h_out, w_out, c_out_pad), jnp.float32),
        grid=(N, n_ci),
        in_specs=[
            pl.BlockSpec((1, Hp, Wp, c_tile), lambda n, ci: (n, 0, 0, ci)),       # x (pre-padded)
            pl.BlockSpec((ksize, ksize, c_tile), lambda n, ci: (0, 0, ci)),       # dw weights (BN1-folded)
            pl.BlockSpec((1, c_tile), lambda n, ci: (0, ci)),                     # bn1 bias
            pl.BlockSpec((c_tile, c_out_pad), lambda n, ci: (ci, 0)),             # pw weights (bf16)
            pl.BlockSpec((1, c_out_pad), lambda n, ci: (0, 0)),                   # bn2 scale
            pl.BlockSpec((1, c_out_pad), lambda n, ci: (0, 0)),                   # bn2 bias
        ],
        out_specs=pl.BlockSpec((1, h_out, w_out, c_out_pad),
                               lambda n, ci: (n, 0, 0, 0)),
        scratch_shapes=[pltpu.VMEM((h_out * w_out, c_out_pad), jnp.float32)],
        compiler_params=pltpu.CompilerParams(
            dimension_semantics=("parallel", "arbitrary"),
            vmem_limit_bytes=_vmem_limit_bytes(),
        ),
        cost_estimate=pl.CostEstimate(flops=flops,
                                      transcendentals=transcendentals,
                                      bytes_accessed=bytes_accessed),
    )(x_nhwc, wdw, b1, wpw, s2, b2)

    # Drop padded output channels, back to NCHW to match the PyTorch module.
    out = out_nhwc[..., :c_out]
    return jnp.transpose(out, (0, 3, 1, 2))


def fold_bn(gamma, beta, mean, var, eps=BN_EPS):
    scale = gamma / jnp.sqrt(var + eps)
    bias = beta - mean * scale
    return scale, bias


def _reference(x, w_dw, w_pw, bn1, bn2, ksize, stride):
    gamma1, beta1, mean1, var1 = bn1
    gamma2, beta2, mean2, var2 = bn2
    C = x.shape[1]
    pad = (ksize - 1) // 2

    def bn(y, gamma, beta, mean, var):
        return ((y - mean[None, :, None, None])
                / jnp.sqrt(var[None, :, None, None] + BN_EPS)
                * gamma[None, :, None, None] + beta[None, :, None, None])

    y = jax.lax.conv_general_dilated(
        x, w_dw, (stride, stride), [(pad, pad), (pad, pad)],
        dimension_numbers=("NCHW", "OIHW", "NCHW"),
        feature_group_count=C, precision=jax.lax.Precision.HIGHEST)
    y = bn(y, gamma1, beta1, mean1, var1)
    y = y * jax.nn.sigmoid(y)

    z = jax.lax.conv_general_dilated(
        y, w_pw, (1, 1), [(0, 0), (0, 0)],
        dimension_numbers=("NCHW", "OIHW", "NCHW"),
        precision=jax.lax.Precision.HIGHEST)
    z = bn(z, gamma2, beta2, mean2, var2)
    return z * jax.nn.sigmoid(z)


if __name__ == "__main__":
    N, C, C_OUT, H, W = 2, 4, 8, 16, 16
    K, STRIDE = 3, 1

    key = jax.random.PRNGKey(0)
    ks = jax.random.split(key, 11)
    x = jax.random.normal(ks[0], (N, C, H, W), jnp.float32)
    w_dw = jax.random.normal(ks[1], (C, 1, K, K), jnp.float32) * 0.3
    w_pw = jax.random.normal(ks[2], (C_OUT, C, 1, 1), jnp.float32) * 0.3
    gamma1 = 1.0 + 0.1 * jax.random.normal(ks[3], (C,), jnp.float32)
    beta1 = 0.1 * jax.random.normal(ks[4], (C,), jnp.float32)
    mean1 = 0.1 * jax.random.normal(ks[5], (C,), jnp.float32)
    var1 = jax.random.uniform(ks[6], (C,), jnp.float32, 0.5, 1.5)
    gamma2 = 1.0 + 0.1 * jax.random.normal(ks[7], (C_OUT,), jnp.float32)
    beta2 = 0.1 * jax.random.normal(ks[8], (C_OUT,), jnp.float32)
    mean2 = 0.1 * jax.random.normal(ks[9], (C_OUT,), jnp.float32)
    var2 = jax.random.uniform(ks[10], (C_OUT,), jnp.float32, 0.5, 1.5)

    # TODO(synk): BatchNorm is implemented with inference (running-stats)
    # semantics; training-mode batch statistics are not computed in-kernel.
    s1, b1 = fold_bn(gamma1, beta1, mean1, var1)
    s2, b2 = fold_bn(gamma2, beta2, mean2, var2)

    out = dwconv_forward(x, w_dw, s1, b1, w_pw, s2, b2,
                         ksize=K, stride=STRIDE)
    out = jax.block_until_ready(out)

    ref = jax.block_until_ready(
        _reference(x, w_dw, w_pw,
                   (gamma1, beta1, mean1, var1),
                   (gamma2, beta2, mean2, var2), K, STRIDE))

    assert out.shape == (N, C_OUT, H, W), out.shape
    # bf16 MXU operands (f32 accumulation) + approx-reciprocal SiLU -> ~1e-2 tol.
    np.testing.assert_allclose(np.asarray(out), np.asarray(ref),
                               rtol=2e-2, atol=2e-2)
    print("KERNEL_OK")
</pallas_src>

<mosaic_0001>
module attributes {stable_mosaic.version = 11 : i64} {
  func.func @_dwconv_kernel(%arg0: i32, %arg1: i32, %arg2: memref<1x18x24x128xf32, #tpu.memory_space<vmem>>, %arg3: memref<3x3x128xf32, #tpu.memory_space<vmem>>, %arg4: memref<1x128xf32, #tpu.memory_space<vmem>>, %arg5: memref<128x128xbf16, #tpu.memory_space<vmem>>, %arg6: memref<1x128xf32, #tpu.memory_space<vmem>>, %arg7: memref<1x128xf32, #tpu.memory_space<vmem>>, %arg8: memref<1x16x16x128xf32, #tpu.memory_space<vmem>>, %arg9: memref<256x128xf32, #tpu.memory_space<vmem>>) attributes {dimension_semantics = [#tpu.dimension_semantics<parallel>, #tpu.dimension_semantics<arbitrary>], iteration_bounds = array<i64: 2, 1>, scalar_prefetch = 0 : i64, scratch_operands = 1 : i64, tpu.core_type = #tpu.core_type<tc>, window_params = [{transform_indices = @transform_0, window_bounds = array<i64: 1, 18, 24, 128>}, {transform_indices = @transform_1, window_bounds = array<i64: 3, 3, 128>}, {transform_indices = @transform_2, window_bounds = array<i64: 1, 128>}, {transform_indices = @transform_3, window_bounds = array<i64: 128, 128>}, {pipeline_mode = #tpu.pipeline_mode<synchronous>, transform_indices = @transform_4, window_bounds = array<i64: 1, 128>}, {pipeline_mode = #tpu.pipeline_mode<synchronous>, transform_indices = @transform_5, window_bounds = array<i64: 1, 128>}, {transform_indices = @transform_6, window_bounds = array<i64: 1, 16, 16, 128>}]} {
    %c0_i32 = arith.constant 0 : i32
    %0 = arith.cmpi eq, %arg1, %c0_i32 : i32
    %1 = arith.extui %0 : i1 to i32
    %c0_i32_0 = arith.constant 0 : i32
    %2 = arith.cmpi ne, %1, %c0_i32_0 : i32
    scf.if %2 {
      %cst_20 = arith.constant 0.000000e+00 : f32
      %100 = vector.broadcast %cst_20 : f32 to vector<256x128xf32>
      %c0_21 = arith.constant 0 : index
      %c0_22 = arith.constant 0 : index
      %101 = vector.load %arg9[%c0_21, %c0_22] : memref<256x128xf32, #tpu.memory_space<vmem>>, vector<256x128xf32>
      tpu.vector_store %arg9[%c0_21, %c0_22], %100 {strides = array<i32>} : memref<256x128xf32, #tpu.memory_space<vmem>>, vector<256x128xf32>,
    } else {
    }
    %c0 = arith.constant 0 : index
    %c0_1 = arith.constant 0 : index
    %c0_2 = arith.constant 0 : index
    %c0_3 = arith.constant 0 : index
    %3 = vector.load %arg2[%c0, %c0_1, %c0_2, %c0_3] : memref<1x18x24x128xf32, #tpu.memory_space<vmem>>, vector<1x18x24x128xf32>
    %4 = vector.shape_cast %3 : vector<1x18x24x128xf32> to vector<18x24x128xf32>
    %5 = vector.shape_cast %4 : vector<18x24x128xf32> to vector<432x128xf32>
    %c0_4 = arith.constant 0 : index
    %c0_5 = arith.constant 0 : index
    %c0_6 = arith.constant 0 : index
    %6 = vector.load %arg3[%c0_4, %c0_5, %c0_6] : memref<3x3x128xf32, #tpu.memory_space<vmem>>, vector<3x3x128xf32>
    %cst = arith.constant 0.000000e+00 : f32
    %7 = vector.broadcast %cst : f32 to vector<16x16x128xf32>
    %8 = vector.extract_strided_slice %4 {offsets = [0, 0, 0], sizes = [18, 16, 128], strides = [1, 1, 1]} : vector<18x24x128xf32> to vector<18x16x128xf32>
    %9 = vector.extract_strided_slice %8 {offsets = [0, 0, 0], sizes = [16, 16, 128], strides = [1, 1, 1]} : vector<18x16x128xf32> to vector<16x16x128xf32>
    %10 = vector.extract_strided_slice %6 {offsets = [0, 0, 0], sizes = [1, 1, 128], strides = [1, 1, 1]} : vector<3x3x128xf32> to vector<1x1x128xf32>
    %11 = vector.shape_cast %10 : vector<1x1x128xf32> to vector<128xf32>
    %12 = vector.shape_cast %11 : vector<128xf32> to vector<1x1x128xf32>
    %13 = vector.broadcast %12 : vector<1x1x128xf32> to vector<16x16x128xf32>
    %14 = arith.mulf %13, %9 : vector<16x16x128xf32>
    %15 = arith.addf %7, %14 : vector<16x16x128xf32>
    %16 = vector.extract_strided_slice %8 {offsets = [1, 0, 0], sizes = [16, 16, 128], strides = [1, 1, 1]} : vector<18x16x128xf32> to vector<16x16x128xf32>
    %17 = vector.extract_strided_slice %6 {offsets = [1, 0, 0], sizes = [1, 1, 128], strides = [1, 1, 1]} : vector<3x3x128xf32> to vector<1x1x128xf32>
    %18 = vector.shape_cast %17 : vector<1x1x128xf32> to vector<128xf32>
    %19 = vector.shape_cast %18 : vector<128xf32> to vector<1x1x128xf32>
    %20 = vector.broadcast %19 : vector<1x1x128xf32> to vector<16x16x128xf32>
    %21 = arith.mulf %20, %16 : vector<16x16x128xf32>
    %22 = arith.addf %15, %21 : vector<16x16x128xf32>
    %23 = vector.extract_strided_slice %8 {offsets = [2, 0, 0], sizes = [16, 16, 128], strides = [1, 1, 1]} : vector<18x16x128xf32> to vector<16x16x128xf32>
    %24 = vector.extract_strided_slice %6 {offsets = [2, 0, 0], sizes = [1, 1, 128], strides = [1, 1, 1]} : vector<3x3x128xf32> to vector<1x1x128xf32>
    %25 = vector.shape_cast %24 : vector<1x1x128xf32> to vector<128xf32>
    %26 = vector.shape_cast %25 : vector<128xf32> to vector<1x1x128xf32>
    %27 = vector.broadcast %26 : vector<1x1x128xf32> to vector<16x16x128xf32>
    %28 = arith.mulf %27, %23 : vector<16x16x128xf32>
    %29 = arith.addf %22, %28 : vector<16x16x128xf32>
    %c431_i32 = arith.constant 431 : i32
    %30 = tpu.dynamic_rotate %5 by %c431_i32 dim 0 : vector<432x128xf32>, i32 -> vector<432x128xf32>
    %31 = vector.shape_cast %30 : vector<432x128xf32> to vector<18x24x128xf32>
    %32 = vector.extract_strided_slice %31 {offsets = [0, 0, 0], sizes = [18, 16, 128], strides = [1, 1, 1]} : vector<18x24x128xf32> to vector<18x16x128xf32>
    %33 = vector.extract_strided_slice %32 {offsets = [0, 0, 0], sizes = [16, 16, 128], strides = [1, 1, 1]} : vector<18x16x128xf32> to vector<16x16x128xf32>
    %34 = vector.extract_strided_slice %6 {offsets = [0, 1, 0], sizes = [1, 1, 128], strides = [1, 1, 1]} : vector<3x3x128xf32> to vector<1x1x128xf32>
    %35 = vector.shape_cast %34 : vector<1x1x128xf32> to vector<128xf32>
    %36 = vector.shape_cast %35 : vector<128xf32> to vector<1x1x128xf32>
    %37 = vector.broadcast %36 : vector<1x1x128xf32> to vector<16x16x128xf32>
    %38 = arith.mulf %37, %33 : vector<16x16x128xf32>
    %39 = arith.addf %29, %38 : vector<16x16x128xf32>
    %40 = vector.extract_strided_slice %32 {offsets = [1, 0, 0], sizes = [16, 16, 128], strides = [1, 1, 1]} : vector<18x16x128xf32> to vector<16x16x128xf32>
    %41 = vector.extract_strided_slice %6 {offsets = [1, 1, 0], sizes = [1, 1, 128], strides = [1, 1, 1]} : vector<3x3x128xf32> to vector<1x1x128xf32>
    %42 = vector.shape_cast %41 : vector<1x1x128xf32> to vector<128xf32>
    %43 = vector.shape_cast %42 : vector<128xf32> to vector<1x1x128xf32>
    %44 = vector.broadcast %43 : vector<1x1x128xf32> to vector<16x16x128xf32>
    %45 = arith.mulf %44, %40 : vector<16x16x128xf32>
    %46 = arith.addf %39, %45 : vector<16x16x128xf32>
    %47 = vector.extract_strided_slice %32 {offsets = [2, 0, 0], sizes = [16, 16, 128], strides = [1, 1, 1]} : vector<18x16x128xf32> to vector<16x16x128xf32>
    %48 = vector.extract_strided_slice %6 {offsets = [2, 1, 0], sizes = [1, 1, 128], strides = [1, 1, 1]} : vector<3x3x128xf32> to vector<1x1x128xf32>
    %49 = vector.shape_cast %48 : vector<1x1x128xf32> to vector<128xf32>
    %50 = vector.shape_cast %49 : vector<128xf32> to vector<1x1x128xf32>
    %51 = vector.broadcast %50 : vector<1x1x128xf32> to vector<16x16x128xf32>
    %52 = arith.mulf %51, %47 : vector<16x16x128xf32>
    %53 = arith.addf %46, %52 : vector<16x16x128xf32>
    %c430_i32 = arith.constant 430 : i32
    %54 = tpu.dynamic_rotate %5 by %c430_i32 dim 0 : vector<432x128xf32>, i32 -> vector<432x128xf32>
    %55 = vector.shape_cast %54 : vector<432x128xf32> to vector<18x24x128xf32>
    %56 = vector.extract_strided_slice %55 {offsets = [0, 0, 0], sizes = [18, 16, 128], strides = [1, 1, 1]} : vector<18x24x128xf32> to vector<18x16x128xf32>
    %57 = vector.extract_strided_slice %56 {offsets = [0, 0, 0], sizes = [16, 16, 128], strides = [1, 1, 1]} : vector<18x16x128xf32> to vector<16x16x128xf32>
    %58 = vector.extract_strided_slice %6 {offsets = [0, 2, 0], sizes = [1, 1, 128], strides = [1, 1, 1]} : vector<3x3x128xf32> to vector<1x1x128xf32>
    %59 = vector.shape_cast %58 : vector<1x1x128xf32> to vector<128xf32>
    %60 = vector.shape_cast %59 : vector<128xf32> to vector<1x1x128xf32>
    %61 = vector.broadcast %60 : vector<1x1x128xf32> to vector<16x16x128xf32>
    %62 = arith.mulf %61, %57 : vector<16x16x128xf32>
    %63 = arith.addf %53, %62 : vector<16x16x128xf32>
    %64 = vector.extract_strided_slice %56 {offsets = [1, 0, 0], sizes = [16, 16, 128], strides = [1, 1, 1]} : vector<18x16x128xf32> to vector<16x16x128xf32>
    %65 = vector.extract_strided_slice %6 {offsets = [1, 2, 0], sizes = [1, 1, 128], strides = [1, 1, 1]} : vector<3x3x128xf32> to vector<1x1x128xf32>
    %66 = vector.shape_cast %65 : vector<1x1x128xf32> to vector<128xf32>
    %67 = vector.shape_cast %66 : vector<128xf32> to vector<1x1x128xf32>
    %68 = vector.broadcast %67 : vector<1x1x128xf32> to vector<16x16x128xf32>
    %69 = arith.mulf %68, %64 : vector<16x16x128xf32>
    %70 = arith.addf %63, %69 : vector<16x16x128xf32>
    %71 = vector.extract_strided_slice %56 {offsets = [2, 0, 0], sizes = [16, 16, 128], strides = [1, 1, 1]} : vector<18x16x128xf32> to vector<16x16x128xf32>
    %72 = vector.extract_strided_slice %6 {offsets = [2, 2, 0], sizes = [1, 1, 128], strides = [1, 1, 1]} : vector<3x3x128xf32> to vector<1x1x128xf32>
    %73 = vector.shape_cast %72 : vector<1x1x128xf32> to vector<128xf32>
    %74 = vector.shape_cast %73 : vector<128xf32> to vector<1x1x128xf32>
    %75 = vector.broadcast %74 : vector<1x1x128xf32> to vector<16x16x128xf32>
    %76 = arith.mulf %75, %71 : vector<16x16x128xf32>
    %77 = arith.addf %70, %76 : vector<16x16x128xf32>
    %c0_7 = arith.constant 0 : index
    %c0_8 = arith.constant 0 : index
    %78 = vector.load %arg4[%c0_7, %c0_8] : memref<1x128xf32, #tpu.memory_space<vmem>>, vector<1x128xf32>
    %79 = vector.shape_cast %78 : vector<1x128xf32> to vector<128xf32>
    %80 = vector.shape_cast %79 : vector<128xf32> to vector<1x1x128xf32>
    %81 = vector.broadcast %80 : vector<1x1x128xf32> to vector<16x16x128xf32>
    %82 = arith.addf %77, %81 : vector<16x16x128xf32>
    %cst_9 = arith.constant 0.000000e+00 : f32
    %83 = vector.broadcast %cst_9 : f32 to vector<16x16x128xf32>
    %84 = arith.subf %83, %82 : vector<16x16x128xf32>
    %85 = math.exp %84 : vector<16x16x128xf32>
    %cst_10 = arith.constant 1.000000e+00 : f32
    %86 = vector.broadcast %cst_10 : f32 to vector<16x16x128xf32>
    %87 = arith.addf %86, %85 : vector<16x16x128xf32>
    %88 = tpu.reciprocal %87 {approx = true} : vector<16x16x128xf32> -> vector<16x16x128xf32>
    %89 = arith.mulf %82, %88 : vector<16x16x128xf32>
    %90 = vector.shape_cast %89 : vector<16x16x128xf32> to vector<256x128xf32>
    %91 = arith.truncf %90 : vector<256x128xf32> to vector<256x128xbf16>
    %c0_11 = arith.constant 0 : index
    %c0_12 = arith.constant 0 : index
    %92 = vector.load %arg9[%c0_11, %c0_12] : memref<256x128xf32, #tpu.memory_space<vmem>>, vector<256x128xf32>
    %c0_13 = arith.constant 0 : index
    %c0_14 = arith.constant 0 : index
    %93 = vector.load %arg5[%c0_13, %c0_14] : memref<128x128xbf16, #tpu.memory_space<vmem>>, vector<128x128xbf16>
    %cst_15 = arith.constant dense<0.000000e+00> : vector<256x128xf32>
    %94 = tpu.matmul %91, %93, %cst_15 {dimension_numbers = #tpu.dot_dimension_numbers<[1], [0], [0], [1], [0, 0, 1, 1], [], []>} : vector<256x128xbf16>, vector<128x128xbf16>, vector<256x128xf32> -> vector<256x128xf32>
    %95 = arith.addf %92, %94 : vector<256x128xf32>
    %c0_16 = arith.constant 0 : index
    %c0_17 = arith.constant 0 : index
    %96 = vector.load %arg9[%c0_16, %c0_17] : memref<256x128xf32, #tpu.memory_space<vmem>>, vector<256x128xf32>
    tpu.vector_store %arg9[%c0_16, %c0_17], %95 {strides = array<i32>} : memref<256x128xf32, #tpu.memory_space<vmem>>, vector<256x128xf32>,
    %c0_i32_18 = arith.constant 0 : i32
    %97 = arith.cmpi eq, %arg1, %c0_i32_18 : i32
    %98 = arith.extui %97 : i1 to i32
    %c0_i32_19 = arith.constant 0 : i32
    %99 = arith.cmpi ne, %98, %c0_i32_19 : i32
    scf.if %99 {
      %c0_20 = arith.constant 0 : index
      %c0_21 = arith.constant 0 : index
      %100 = vector.load %arg9[%c0_20, %c0_21] : memref<256x128xf32, #tpu.memory_space<vmem>>, vector<256x128xf32>
      %c0_22 = arith.constant 0 : index
      %c0_23 = arith.constant 0 : index
      %101 = vector.load %arg6[%c0_22, %c0_23] : memref<1x128xf32, #tpu.memory_space<vmem>>, vector<1x128xf32>
      %102 = vector.shape_cast %101 : vector<1x128xf32> to vector<128xf32>
      %103 = vector.shape_cast %102 : vector<128xf32> to vector<1x128xf32>
      %104 = vector.broadcast %103 : vector<1x128xf32> to vector<256x128xf32>
      %105 = arith.mulf %100, %104 : vector<256x128xf32>
      %c0_24 = arith.constant 0 : index
      %c0_25 = arith.constant 0 : index
      %106 = vector.load %arg7[%c0_24, %c0_25] : memref<1x128xf32, #tpu.memory_space<vmem>>, vector<1x128xf32>
      %107 = vector.shape_cast %106 : vector<1x128xf32> to vector<128xf32>
      %108 = vector.shape_cast %107 : vector<128xf32> to vector<1x128xf32>
      %109 = vector.broadcast %108 : vector<1x128xf32> to vector<256x128xf32>
      %110 = arith.addf %105, %109 : vector<256x128xf32>
      %cst_26 = arith.constant 0.000000e+00 : f32
      %111 = vector.broadcast %cst_26 : f32 to vector<256x128xf32>
      %112 = arith.subf %111, %110 : vector<256x128xf32>
      %113 = math.exp %112 : vector<256x128xf32>
      %cst_27 = arith.constant 1.000000e+00 : f32
      %114 = vector.broadcast %cst_27 : f32 to vector<256x128xf32>
      %115 = arith.addf %114, %113 : vector<256x128xf32>
      %116 = tpu.reciprocal %115 {approx = true} : vector<256x128xf32> -> vector<256x128xf32>
      %117 = arith.mulf %110, %116 : vector<256x128xf32>
      %118 = vector.shape_cast %117 : vector<256x128xf32> to vector<16x16x128xf32>
      %c0_28 = arith.constant 0 : index
      %c0_29 = arith.constant 0 : index
      %c0_30 = arith.constant 0 : index
      %c0_31 = arith.constant 0 : index
      %119 = vector.load %arg8[%c0_28, %c0_29, %c0_30, %c0_31] : memref<1x16x16x128xf32, #tpu.memory_space<vmem>>, vector<1x16x16x128xf32>
      %120 = vector.shape_cast %119 : vector<1x16x16x128xf32> to vector<16x16x128xf32>
      %121 = vector.shape_cast %118 : vector<16x16x128xf32> to vector<1x16x16x128xf32>
      tpu.vector_store %arg8[%c0_28, %c0_29, %c0_30, %c0_31], %121 {strides = array<i32>} : memref<1x16x16x128xf32, #tpu.memory_space<vmem>>, vector<1x16x16x128xf32>,
    } else {
    }
    return
  }
  func.func @transform_0(%arg0: i32, %arg1: i32) -> (i32, i32, i32, i32) {
    %c0_i32 = arith.constant 0 : i32
    %c0_i32_0 = arith.constant 0 : i32
    %c0_i32_1 = arith.constant 0 : i32
    return %arg0, %c0_i32, %c0_i32_0, %arg1 : i32, i32, i32, i32
  }
  func.func @transform_1(%arg0: i32, %arg1: i32) -> (i32, i32, i32) {
    %c0_i32 = arith.constant 0 : i32
    %c0_i32_0 = arith.constant 0 : i32
    %c0_i32_1 = arith.constant 0 : i32
    return %c0_i32, %c0_i32_0, %arg1 : i32, i32, i32
  }
  func.func @transform_2(%arg0: i32, %arg1: i32) -> (i32, i32) {
    %c0_i32 = arith.constant 0 : i32
    %c0_i32_0 = arith.constant 0 : i32
    return %c0_i32, %arg1 : i32, i32
  }
  func.func @transform_3(%arg0: i32, %arg1: i32) -> (i32, i32) {
    %c0_i32 = arith.constant 0 : i32
    %c0_i32_0 = arith.constant 0 : i32
    return %arg1, %c0_i32 : i32, i32
  }
  func.func @transform_4(%arg0: i32, %arg1: i32) -> (i32, i32) {
    %c0_i32 = arith.constant 0 : i32
    %c0_i32_0 = arith.constant 0 : i32
    %c0_i32_1 = arith.constant 0 : i32
    return %c0_i32, %c0_i32_0 : i32, i32
  }
  func.func @transform_5(%arg0: i32, %arg1: i32) -> (i32, i32) {
    %c0_i32 = arith.constant 0 : i32
    %c0_i32_0 = arith.constant 0 : i32
    %c0_i32_1 = arith.constant 0 : i32
    return %c0_i32, %c0_i32_0 : i32, i32
  }
  func.func @transform_6(%arg0: i32, %arg1: i32) -> (i32, i32, i32, i32) {
    %c0_i32 = arith.constant 0 : i32
    %c0_i32_0 = arith.constant 0 : i32
    %c0_i32_1 = arith.constant 0 : i32
    %c0_i32_2 = arith.constant 0 : i32
    return %arg0, %c0_i32, %c0_i32_0, %c0_i32_1 : i32, i32, i32, i32
  }
}

</mosaic_0001>

<bundles_post_ra>
// kernel: dwconv_forward.1
= control target key start
LH: loop header
LB: loop body
LE: loop exit
PB: predicated region body
PF: predicated region fallthrough
CT: control target
= control target key end

     0   :  { %s2701_s21 = smov 0   ;;  %s2703_s22 = smov 0   ;;  %s4202_s0 = inlined_call_operand.vmem [shape: f32[2,18,24,128], index: 0, kind: input, shape index: {}]   ;;  %s4203_s1 = inlined_call_operand.vmem [shape: f32[3,3,128], index: 1, kind: input, shape index: {}]   ;;  %s4204_s2 = inlined_call_operand.vmem [shape: f32[1,128], index: 2, kind: input, shape index: {}]   ;;  %s4205_s3 = inlined_call_operand.vmem [shape: bf16[128,128], index: 3, kind: input, shape index: {}]   ;;  %s4206_s4 = inlined_call_operand.vmem [shape: f32[1,128], index: 4, kind: input, shape index: {}]   ;;  %s4207_s5 = inlined_call_operand.vmem [shape: f32[1,128], index: 5, kind: input, shape index: {}]   ;;  %s4208_s6 = inlined_call_operand.vmem [shape: f32[2,16,16,128], index: 6, kind: output, shape index: {}]  }
   0x1   :  { %s2705_s23 = smov 0  }
   0x2 LB: > { %s28_s24 = sadd.s32 1, %s2660_s22  ;;  %p2242_p0 = scmp.ge.s32.totalorder %s2664_s23, 1  ;;  %s2664_s23 = sphi %s2705_s23, %s16_s23   ;;  %s2660_s22 = sphi %s2703_s22, %s4282_s22   ;;  %s2656_s21 = sphi %s2701_s21, %s4281_s21  }
   0x3   : > { %p30_p1 = scmp.ge.s32.totalorder %s28_s24, 2  ;;  %p257_p2 = scmp.lt.s32.totalorder %s2664_s23, 3 }
   0x5   : > { %s4284_s24 = smov (%p30_p1, %s28_s24), 0  ;;  %p258_p3 = pnand %p2242_p0, %p257_p2 }
   0x7   : > { %261 = sbr.rel (%p258_p3) target bundleno = 549 (0x225), region = 44 }
   0xe   : > { %v2373_v0 = vld [vmem:[%s4205_s3] sm:$0xff]   ;;  %p302_p4 = scmp.lt.s32.totalorder %s2656_s21, 1  ;;  %v422_v1 = vlaneseq  ;;  %v2374_v2 = vld [vmem:[%s4205_s3 + $0x8] sm:$0xff]   ;;  %v2375_v3 = vld [vmem:[%s4205_s3 + $0x10] sm:$0xff]  }
   0xf   : > { %2284 = vmatprep.subr.bf16.mxu0 %v2373_v0  ;;  %2332 = vmatprep.subr.bf16.mxu1 %v2373_v0  ;;  %v2376_v5 = vld [vmem:[%s4205_s3 + $0x18] sm:$0xff]   ;;  %v2780_v23 = vld [vmem:[%s4203_s1] sm:$0x7]  ;;  %v2785_v24 = vld [vmem:[%s4203_s1 + $0x4] sm:$0x7] }
  0x10   : > { %s4286_s21 = smov (!%p302_p4, %s2656_s21), 1  ;;  %2285 = vmatpush3.bf16.msra.mxu0 %v2373_v0  ;;  %2340 = vmatpush3.bf16.msra.mxu1 %v2373_v0  ;;  %v2731_v4 = vshrl.u32 %v422_v1, 7  ;;  %v2790_v25 = vld [vmem:[%s4203_s1 + $0x8] sm:$0x7]  ;;  %v2377_v28 = vld [vmem:[%s4205_s3 + $0x20] sm:$0xff]   ;;  %v2379_v63 = vld [vmem:[%s4205_s3 + $0x30] sm:$0xff]  }
  0x11   : > { %2286 = vmatprep.subr.bf16.mxu0 %v2374_v2  ;;  %2333 = vmatprep.subr.bf16.mxu1 %v2374_v2  ;;  %s2348_s7 = smul.u32 432, %s4286_s21  ;;  %v2378_v46 = vld [vmem:[%s4205_s3 + $0x28] sm:$0xff]   ;;  %s2259_s15 = sshll.u32 %s4286_s21, 8 }
  0x12   : > { %v424_v9 = vsub.s32 0, %v2731_v4  ;;  %vm682_vm0 = vcmp.lt.s32.totalorder %v2731_v4, 7  ;;  %v721_v10 = vsub.s32 1, %v2731_v4  ;;  %v2775_v22 = vsub.s32 2, %v2731_v4  ;;  %s4083_s18 = scalar_lea.vmem %s4208_s6, %s2259_s15 }
  0x13   : > { %s2736_s10 = scalar_lea.vmem %s4202_s0, %s2348_s7  ;;  %vm977_vm1 = vcmp.lt.s32.totalorder %v2731_v4, 6 }
  0x14   : > { %2287 = vmatpush3.bf16.msra.mxu0 %v2374_v2  ;;  %2341 = vmatpush3.bf16.msra.mxu1 %v2374_v2  ;;  %v2742_v6 = vld [vmem:[%s2736_s10] sm:$0xff]  ;;  %v2745_v7 = vld [vmem:[%s2736_s10 + $0x8] sm:$0xff]  ;;  %v2748_v8 = vld [vmem:[%s2736_s10 + $0x10] sm:$0xff]  ;;  %v2803_v30 = vrot.slane %v2780_v23, %v424_v9  ;;  %v2806_v31 = vrot.slane %v2785_v24, %v424_v9  ;;  %v2809_v32 = vrot.slane %v2790_v25, %v424_v9 }
  0x15   : > { %2288 = vmatprep.subr.bf16.mxu0 %v2375_v3  ;;  %2334 = vmatprep.subr.bf16.mxu1 %v2375_v3  ;;  %v2754_v11 = vld [vmem:[%s2736_s10 + $0x18] sm:$0xff]  ;;  %v2757_v12 = vld [vmem:[%s2736_s10 + $0x20] sm:$0xff]  ;;  %v2760_v13 = vld [vmem:[%s2736_s10 + $0x28] sm:$0xff]  ;;  %v626_v14 = vrot.slane %v2742_v6, 1  ;;  %v627_v15 = vrot.slane %v2745_v7, 1  ;;  %v628_v16 = vrot.slane %v2748_v8, 1  ;;  %v2849_v53 = vrot.slane %v2780_v23, %v721_v10 }
  0x16   : > { %v2766_v17 = vld [vmem:[%s2736_s10 + $0x30] sm:$0xff]  ;;  %v2769_v18 = vld [vmem:[%s2736_s10 + $0x40] sm:$0xff]  ;;  %v629_v19 = vrot.slane %v2754_v11, 1  ;;  %v630_v20 = vrot.slane %v2757_v12, 1  ;;  %v631_v21 = vrot.slane %v2760_v13, 1  ;;  %v2800_v29 = vld [vmem:[%s2736_s10 + $0x38] sm:$0xff]  ;;  %v426_v38 = vmul.f32 %v2803_v30, %v2742_v6 }
  0x17   : > { %v717_v26 = vsel %vm682_vm0, %v627_v15, %v628_v16  ;;  %v718_v27 = vsel %vm682_vm0, %v626_v14, %v627_v15  ;;  %v632_v33 = vrot.slane %v2766_v17, 1  ;;  %v633_v34 = vrot.slane %v2800_v29, 1  ;;  %4235 = vst [vmem:[#allocation3_spill] sm:$0xff] %v2849_v53 }
  0x18   : > { %2289 = vmatpush3.bf16.msra.mxu0 %v2375_v3  ;;  %2342 = vmatpush3.bf16.msra.mxu1 %v2375_v3  ;;  %v634_v35 = vrot.slane %v2769_v18, 1  ;;  %v715_v36 = vsel %vm682_vm0, %v630_v20, %v631_v21  ;;  %v716_v37 = vsel %vm682_vm0, %v629_v19, %v630_v20  ;;  %v427_v39 = vmul.f32 %v2803_v30, %v2745_v7  ;;  %v2380_v19 = vld [vmem:[%s4205_s3 + $0x38] sm:$0xff]  }
  0x19   : > { %2290 = vmatprep.subr.bf16.mxu0 %v2376_v5  ;;  %2335 = vmatprep.subr.bf16.mxu1 %v2376_v5  ;;  %v2825_v40 = vmul.f32 %v2803_v30, %v2754_v11  ;;  %v2829_v41 = vmul.f32 %v2803_v30, %v2757_v12  ;;  %v494_v42 = vmul.f32 %v2806_v31, %v2754_v11  ;;  %v923_v45 = vrot.slane %v2742_v6, 2 }
  0x1a   : > { %v495_v43 = vmul.f32 %v2806_v31, %v2757_v12  ;;  %v562_v44 = vmul.f32 %v2809_v32, %v2766_v17  ;;  %v563_v47 = vmul.f32 %v2809_v32, %v2800_v29  ;;  %v713_v48 = vsel %vm682_vm0, %v633_v34, %v634_v35 }
  0x1b   : > { %v714_v49 = vsel %vm682_vm0, %v632_v33, %v633_v34  ;;  %v924_v50 = vrot.slane %v2745_v7, 2  ;;  %v526_v51 = vadd.f32 %v494_v42, %v426_v38  ;;  %v2852_v54 = vrot.slane %v2785_v24, %v721_v10  ;;  %v2902_v33 = vld [vmem:[%s2736_s10 + $0xc8] sm:$0xff] }
  0x1c   : > { %2291 = vmatpush3.bf16.msra.mxu0 %v2376_v5  ;;  %2343 = vmatpush3.bf16.msra.mxu1 %v2376_v5  ;;  %v527_v52 = vadd.f32 %v495_v43, %v427_v39  ;;  %v2855_v55 = vrot.slane %v2790_v25, %v721_v10  ;;  %v925_v56 = vrot.slane %v2748_v8, 2  ;;  %v926_v57 = vrot.slane %v2754_v11, 2 }
  0x1d   : > { %2292 = vmatprep.subr.bf16.mxu0 %v2377_v28  ;;  %2336 = vmatprep.subr.bf16.mxu1 %v2377_v28  ;;  %v927_v58 = vrot.slane %v2757_v12, 2  ;;  %v594_v59 = vadd.f32 %v562_v44, %v526_v51  ;;  %v723_v61 = vmul.f32 %v2849_v53, %v718_v27  ;;  %v928_v62 = vrot.slane %v2760_v13, 2 }
  0x1e   : > { %v595_v60 = vadd.f32 %v563_v47, %v527_v52  ;;  %v724_v0 = vmul.f32 %v2849_v53, %v717_v26  ;;  %v2867_v1 = vmul.f32 %v2849_v53, %v716_v37  ;;  %v2870_v2 = vmul.f32 %v2849_v53, %v715_v36  ;;  %v2949_v52 = vld [vmem:[%s2736_s10 + $0xd8] sm:$0xff] }
  0x1f   : > { %v929_v3 = vrot.slane %v2766_v17, 2  ;;  %v2874_v5 = vmul.f32 %v2849_v53, %v714_v49  ;;  %v2877_v6 = vmul.f32 %v2849_v53, %v713_v48  ;;  %v755_v7 = vadd.f32 %v723_v61, %v594_v59  ;;  %v2959_v61 = vld [vmem:[%s2736_s10 + $0xf0] sm:$0xff] }
  0x20   : > { %2293 = vmatpush3.bf16.msra.mxu0 %v2377_v28  ;;  %2344 = vmatpush3.bf16.msra.mxu1 %v2377_v28  ;;  %v791_v8 = vmul.f32 %v2852_v54, %v716_v37  ;;  %v756_v9 = vadd.f32 %v724_v0, %v595_v60  ;;  %v792_v10 = vmul.f32 %v2852_v54, %v715_v36  ;;  %v930_v16 = vrot.slane %v2800_v29, 2  ;;  %v2899_v28 = vld [vmem:[%s2736_s10 + $0xc0] sm:$0xff] }
  0x21   : > { %2294 = vmatprep.subr.bf16.mxu0 %v2378_v46  ;;  %2337 = vmatprep.subr.bf16.mxu1 %v2378_v46  ;;  %v2882_v11 = vmul.f32 %v2852_v54, %v714_v49  ;;  %v2885_v12 = vmul.f32 %v2852_v54, %v713_v48  ;;  %v859_v14 = vmul.f32 %v2855_v55, %v714_v49  ;;  %v931_v21 = vrot.slane %v2769_v18, 2 }
  0x22   : > { %v823_v13 = vadd.f32 %v791_v8, %v755_v7  ;;  %v860_v15 = vmul.f32 %v2855_v55, %v713_v48  ;;  %v824_v20 = vadd.f32 %v792_v10, %v756_v9  ;;  %v1010_v26 = vsel %vm977_vm1, %v927_v58, %v928_v62  ;;  %4237 = vst [vmem:[#allocation5_spill] sm:$0xff] %v2959_v61  ;;  %v2962_v62 = vld [vmem:[%s2736_s10 + $0xf8] sm:$0xff]  ;;  %v2971_v10 = vld [vmem:[%s2736_s10 + $0xe8] sm:$0xff] }
  0x23   : > { %v1011_v27 = vsel %vm977_vm1, %v926_v57, %v927_v58  ;;  %v1009_v35 = vsel %vm977_vm1, %v929_v3, %v930_v16  ;;  %v1012_v36 = vsel %vm977_vm1, %v924_v50, %v925_v56  ;;  %v1013_v18 = vsel %vm977_vm1, %v923_v45, %v924_v50  ;;  %v2952_v56 = vld [vmem:[%s2736_s10 + $0xe0] sm:$0xff]  ;;  %4238 = vst [vmem:[#allocation6_spill] sm:$0xff] %v2962_v62 }
  0x24   : > { %2295 = vmatpush3.bf16.msra.mxu0 %v2378_v46  ;;  %2345 = vmatpush3.bf16.msra.mxu1 %v2378_v46  ;;  %v891_v34 = vadd.f32 %v859_v14, %v823_v13  ;;  %v892_v37 = vadd.f32 %v860_v15, %v824_v20  ;;  %v1008_v38 = vsel %vm977_vm1, %v930_v16, %v931_v21  ;;  %v651_v47 = vrot.slane %v2902_v33, 1  ;;  %v2974_v13 = vld [vmem:[%s2736_s10 + $0x100] sm:$0xff] }
  0x25   : > { %2296 = vmatprep.subr.bf16.mxu0 %v2379_v63  ;;  %2338 = vmatprep.subr.bf16.mxu1 %v2379_v63  ;;  %v2914_v39 = vrot.slane %v2780_v23, %v2775_v22  ;;  %v2918_v42 = vrot.slane %v2785_v24, %v2775_v22  ;;  %v2922_v43 = vrot.slane %v2790_v25, %v2775_v22  ;;  %v650_v23 = vrot.slane %v2899_v28, 1  ;;  %v2935_v25 = vld [vmem:[%s2736_s10 + $0xd0] sm:$0xff]  ;;  %v2983_v16 = vld [vmem:[%s4204_s2] ss:$0 sm:$0xff] }
  0x26   : > { %v442_v44 = vmul.f32 %v2803_v30, %v2899_v28  ;;  %v443_v45 = vmul.f32 %v2803_v30, %v2902_v33  ;;  %v652_v7 = vrot.slane %v2935_v25, 1  ;;  %v510_v14 = vmul.f32 %v2806_v31, %v2949_v52 }
  0x27   : > { %4236 = vst [vmem:[#allocation4_spill] sm:$0xff] %v2914_v39  ;;  %v1018_v24 = vmul.f32 %v2914_v39, %v1013_v18  ;;  %v1019_v46 = vmul.f32 %v2914_v39, %v1012_v36  ;;  %v2932_v22 = vmul.f32 %v2914_v39, %v1011_v27  ;;  %v2939_v48 = vmul.f32 %v2914_v39, %v1010_v26 }
  0x28   : > { %2297 = vmatpush3.bf16.msra.mxu0 %v2379_v63  ;;  %2346 = vmatpush3.bf16.msra.mxu1 %v2379_v63  ;;  %v2942_v49 = vmul.f32 %v2914_v39, %v1009_v35  ;;  %v2945_v50 = vmul.f32 %v2914_v39, %v1008_v38  ;;  %v1086_v51 = vmul.f32 %v2918_v42, %v1011_v27  ;;  %v653_v21 = vrot.slane %v2949_v52, 1 }
  0x29   : > { %2298 = vmatprep.subr.bf16.mxu0 %v2380_v19  ;;  %2339 = vmatprep.subr.bf16.mxu1 %v2380_v19  ;;  %v1050_v57 = vadd.f32 %v1018_v24, %v891_v34  ;;  %v1051_v58 = vadd.f32 %v1019_v46, %v892_v37  ;;  %v1087_v59 = vmul.f32 %v2918_v42, %v1010_v26  ;;  %v654_v26 = vrot.slane %v2952_v56, 1 }
  0x2a   : > { %v2956_v60 = vmul.f32 %v2918_v42, %v1009_v35  ;;  %v2965_v63 = vmul.f32 %v2918_v42, %v1008_v38  ;;  %v1154_v0 = vmul.f32 %v2922_v43, %v1009_v35  ;;  %v1155_v3 = vmul.f32 %v2922_v43, %v1008_v38 }
  0x2b   : > { %v1118_v8 = vadd.f32 %v1086_v51, %v1050_v57  ;;  %v1119_v9 = vadd.f32 %v1087_v59, %v1051_v58  ;;  %v511_v15 = vmul.f32 %v2806_v31, %v2952_v56  ;;  %v579_v20 = vmul.f32 %v2809_v32, %v2962_v62 }
  0x2c   : > { %2299 = vmatpush3.bf16.msra.mxu0 %v2380_v19  ;;  %2347 = vmatpush3.bf16.msra.mxu1 %v2380_v19  ;;  %v578_v19 = vmul.f32 %v2809_v32, %v2959_v61  ;;  %v542_v35 = vadd.f32 %v510_v14, %v442_v44  ;;  %v655_v18 = vrot.slane %v2971_v10, 1  ;;  %v656_v37 = vrot.slane %v2959_v61, 1 }
  0x2d   : > { %v1186_v27 = vadd.f32 %v1154_v0, %v1118_v8  ;;  %v1187_v34 = vadd.f32 %v1155_v3, %v1119_v9  ;;  %v543_v36 = vadd.f32 %v511_v15, %v443_v45  ;;  %v657_v38 = vrot.slane %v2962_v62, 1 }
  0x2e   : > { %v658_v24 = vrot.slane %v2974_v13, 1  ;;  %v610_v57 = vadd.f32 %v578_v19, %v542_v35  ;;  %v3007_v59 = vsel %vm682_vm0, %v654_v26, %v655_v18  ;;  %v3011_v0 = vsel %vm682_vm0, %v653_v21, %v654_v26 }
  0x2f   : > { %v2996_v46 = vadd.f32 %v2983_v16, %v1186_v27  ;;  %v2999_v51 = vadd.f32 %v2983_v16, %v1187_v34  ;;  %v611_v58 = vadd.f32 %v579_v20, %v543_v36  ;;  %v698_v45 = vsel %vm682_vm0, %v656_v37, %v657_v38  ;;  %4239 = vst [vmem:[#allocation7_spill] sm:$0xff] %v3007_v59 }
  0x30   : > { %v697_v44 = vsel %vm682_vm0, %v657_v38, %v658_v24  ;;  %4240 = vst [vmem:[#allocation8_spill] sm:$0xff] %v3011_v0  ;;  %v3017_v9 = vsel %vm682_vm0, %v651_v47, %v652_v7  ;;  %v3021_v14 = vsel %vm682_vm0, %v650_v23, %v651_v47  ;;  %v3029_v20 = vmul.f32 %v2849_v53, %v3011_v0 }
  0x31   : > { %v1257_v3 = vsub.f32 0.0, %v2996_v46  ;;  %v1258_v8 = vsub.f32 0.0, %v2999_v51  ;;  %4241 = vst [vmem:[#allocation9_spill] sm:$0xff] %v3017_v9  ;;  %4242 = vst [vmem:[#allocation10_spill] sm:$0xff] %v3021_v14  ;;  %v739_v15 = vmul.f32 %v2849_v53, %v3021_v14  ;;  %v740_v19 = vmul.f32 %v2849_v53, %v3017_v9 }
  0x32   : > { %v3033_v21 = vmul.f32 %v2849_v53, %v3007_v59  ;;  %v3036_v27 = vmul.f32 %v2849_v53, %v698_v45  ;;  %v3039_v23 = vmul.f32 %v2849_v53, %v697_v44  ;;  %v807_v35 = vmul.f32 %v2852_v54, %v3011_v0 }
  0x33   : > { %v1289_v7 = vmul.f32 1.442695, %v1257_v3  ;;  %v1291_v26 = vmul.f32 1.442695, %v1258_v8  ;;  %v771_v47 = vadd.f32 %v739_v15, %v610_v57  ;;  %v772_v34 = vadd.f32 %v740_v19, %v611_v58 }
  0x34   : > { %4243 = vst [vmem:[#allocation11_spill] sm:$0xff] %v3036_v27  ;;  %4244 = vst [vmem:[#allocation12_spill] sm:$0xff] %v3039_v23  ;;  %v808_v36 = vmul.f32 %v2852_v54, %v3007_v59  ;;  %v3046_v18 = vmul.f32 %v2852_v54, %v698_v45  ;;  %v3049_v37 = vmul.f32 %v2852_v54, %v697_v44  ;;  %v947_v58 = vrot.slane %v2899_v28, 2 }
  0x35   : > { %2381 = vpow2.f32 %v1289_v7  ;;  %v875_v38 = vmul.f32 %v2855_v55, %v698_v45  ;;  %v839_v24 = vadd.f32 %v807_v35, %v771_v47  ;;  %v876_v57 = vmul.f32 %v2855_v55, %v697_v44 }
  0x36   : > { %2383 = vpow2.f32 %v1291_v26  ;;  %v840_v3 = vadd.f32 %v808_v36, %v772_v34  ;;  %v948_v8 = vrot.slane %v2902_v33, 2  ;;  %v949_v15 = vrot.slane %v2935_v25, 2 }
  0x37   : > { %v950_v19 = vrot.slane %v2949_v52, 2  ;;  %v907_v7 = vadd.f32 %v875_v38, %v839_v24  ;;  %v951_v0 = vrot.slane %v2952_v56, 2  ;;  %v952_v9 = vrot.slane %v2971_v10, 2 }
  0x38   : > { %v908_v59 = vadd.f32 %v876_v57, %v840_v3  ;;  %v953_v45 = vrot.slane %v2959_v61, 2  ;;  %v954_v26 = vrot.slane %v2962_v62, 2  ;;  %v955_v44 = vrot.slane %v2974_v13, 2  ;;  %v3101_v3 = vld [vmem:[%s2736_s10 + $0x48] sm:$0xff] }
  0x39   : > { %v3064_v28 = vsel %vm977_vm1, %v948_v8, %v949_v15  ;;  %v3068_v33 = vsel %vm977_vm1, %v951_v0, %v952_v9  ;;  %v3072_v25 = vsel %vm977_vm1, %v950_v19, %v951_v0  ;;  %v3076_v10 = vsel %vm977_vm1, %v947_v58, %v948_v8  ;;  %v3111_v19 = vld [vmem:[%s2736_s10 + $0x50] sm:$0xff] }
  0x3a   : > { %4245 = vst [vmem:[#allocation13_spill] sm:$0xff] %v3064_v28  ;;  %4246 = vst [vmem:[#allocation14_spill] sm:$0xff] %v3068_v33  ;;  %v1035_v13 = vmul.f32 %v2914_v39, %v3064_v28  ;;  %v992_v47 = vsel %vm977_vm1, %v954_v26, %v955_v44  ;;  %v993_v34 = vsel %vm977_vm1, %v953_v45, %v954_v26 }
  0x3b   : > { %4247 = vst [vmem:[#allocation15_spill] sm:$0xff] %v3072_v25  ;;  %4248 = vst [vmem:[#allocation16_spill] sm:$0xff] %v3076_v10  ;;  %v1034_v9 = vmul.f32 %v2914_v39, %v3076_v10  ;;  %v3088_v0 = vmul.f32 %v2914_v39, %v3072_v25  ;;  %v3092_v35 = vmul.f32 %v2914_v39, %v3068_v33 }
  0x3c   : > { %v3095_v36 = vmul.f32 %v2914_v39, %v993_v34  ;;  %v3098_v38 = vmul.f32 %v2914_v39, %v992_v47  ;;  %v1067_v24 = vadd.f32 %v1035_v13, %v908_v59  ;;  %v1102_v58 = vmul.f32 %v2918_v42, %v3072_v25  ;;  %v376_v25 = vld [vmem:[%s2736_s10 + $0x58] sm:$0xff] }
  0x3d   : > { %v1066_v57 = vadd.f32 %v1034_v9, %v907_v7  ;;  %v1103_v8 = vmul.f32 %v2918_v42, %v3068_v33  ;;  %v3108_v15 = vmul.f32 %v2918_v42, %v993_v34  ;;  %v3114_v45 = vmul.f32 %v2918_v42, %v992_v47 }
  0x3e   : > { %4249 = vst [vmem:[#allocation17_spill] sm:$0xff] %v3095_v36  ;;  %4250 = vst [vmem:[#allocation18_spill] sm:$0xff] %v3098_v38  ;;  %v1170_v26 = vmul.f32 %v2922_v43, %v993_v34  ;;  %v1171_v59 = vmul.f32 %v2922_v43, %v992_v47  ;;  %v496_v7 = vmul.f32 %v2806_v31, %v2766_v17  ;;  %v635_v34 = vrot.slane %v3101_v3, 1 }
  0x3f   : > { %v2382_v44 = vpop.eup %2381  ;;  %v1134_v13 = vadd.f32 %v1102_v58, %v1066_v57  ;;  %v1135_v9 = vadd.f32 %v1103_v8, %v1067_v24  ;;  %v497_v33 = vmul.f32 %v2806_v31, %v2800_v29  ;;  %v564_v28 = vmul.f32 %v2809_v32, %v3101_v3 }
  0x40   : > { %v2384_v10 = vpop.eup %2383  ;;  %v1353_v14 = vadd.f32 1.0, %v2382_v44  ;;  %v528_v39 = vadd.f32 %v496_v7, %v2825_v40  ;;  %v565_v47 = vmul.f32 %v2809_v32, %v3111_v19  ;;  %v636_v8 = vrot.slane %v3111_v19, 1 }
  0x41   : > { %v1354_v53 = vadd.f32 1.0, %v2384_v10  ;;  %v1202_v38 = vadd.f32 %v1170_v26, %v1134_v13  ;;  %v1203_v57 = vadd.f32 %v1171_v59, %v1135_v9  ;;  %v529_v24 = vadd.f32 %v497_v33, %v2829_v41 }
  0x42   : > { %2385 = vrcp.f32 %v1353_v14  ;;  %v596_v58 = vadd.f32 %v564_v28, %v528_v39  ;;  %v637_v36 = vrot.slane %v376_v25, 1  ;;  %v3143_v41 = vsel %vm682_vm0, %v635_v34, %v636_v8 }
  0x43   : > { %2387 = vrcp.f32 %v1354_v53  ;;  %v3132_v44 = vadd.f32 %v2983_v16, %v1202_v38  ;;  %v3135_v40 = vadd.f32 %v2983_v16, %v1203_v57  ;;  %v597_v7 = vadd.f32 %v565_v47, %v529_v24  ;;  %v3168_v24 = vld [vmem:[%s2736_s10 + $0x108] sm:$0xff] }
  0x44   : > { %v3139_v10 = vsel %vm682_vm0, %v636_v8, %v637_v36  ;;  %v757_v39 = vadd.f32 %v2867_v1, %v596_v58  ;;  %v932_v14 = vrot.slane %v3101_v3, 2  ;;  %v861_v36 = vmul.f32 %v2855_v55, %v3143_v41 }
  0x45   : > { %v1273_v53 = vsub.f32 0.0, %v3132_v44  ;;  %v1274_v28 = vsub.f32 0.0, %v3135_v40  ;;  %v758_v33 = vadd.f32 %v2870_v2, %v597_v7  ;;  %v862_v26 = vmul.f32 %v2855_v55, %v3139_v10 }
  0x46   : > { %v825_v38 = vadd.f32 %v2882_v11, %v757_v39  ;;  %v933_v1 = vrot.slane %v3111_v19, 2  ;;  %v934_v59 = vrot.slane %v376_v25, 2  ;;  %v444_v34 = vmul.f32 %v2803_v30, %v2949_v52  ;;  %v3171_v25 = vld [vmem:[%s2736_s10 + $0x110] sm:$0xff]  ;;  %v400_v39 = vld [vmem:[%s2736_s10 + $0x118] sm:$0xff] }
  0x47   : > { %v1321_v13 = vmul.f32 1.442695, %v1273_v53  ;;  %v1323_v9 = vmul.f32 1.442695, %v1274_v28  ;;  %v826_v47 = vadd.f32 %v2885_v12, %v758_v33  ;;  %v445_v58 = vmul.f32 %v2803_v30, %v2952_v56 }
  0x48   : > { %v893_v2 = vadd.f32 %v861_v36, %v825_v38  ;;  %v3161_v57 = vsel %vm977_vm1, %v933_v1, %v934_v59  ;;  %v3165_v11 = vsel %vm977_vm1, %v932_v14, %v933_v1  ;;  %v512_v14 = vmul.f32 %v2806_v31, %v2959_v61 }
  0x49   : > { %2389 = vpow2.f32 %v1321_v13  ;;  %v894_v12 = vadd.f32 %v862_v26, %v826_v47  ;;  %v1156_v52 = vmul.f32 %v2922_v43, %v3165_v11  ;;  %v1157_v8 = vmul.f32 %v2922_v43, %v3161_v57 }
  0x4a   : > { %2391 = vpow2.f32 %v1323_v9  ;;  %v1052_v7 = vadd.f32 %v2932_v22, %v893_v2  ;;  %v513_v53 = vmul.f32 %v2806_v31, %v2962_v62  ;;  %v580_v28 = vmul.f32 %v2809_v32, %v3168_v24 }
  0x4b   : > { %v1053_v56 = vadd.f32 %v2939_v48, %v894_v12  ;;  %v581_v33 = vmul.f32 %v2809_v32, %v3171_v25  ;;  %v659_v36 = vrot.slane %v3168_v24, 1  ;;  %v544_v26 = vadd.f32 %v512_v14, %v444_v34 }
  0x4c   : > { %v2386_v38 = vpop.eup %2385  ;;  %v1120_v22 = vadd.f32 %v2956_v60, %v1052_v7  ;;  %v545_v1 = vadd.f32 %v513_v53, %v445_v58  ;;  %v660_v59 = vrot.slane %v3171_v25, 1  ;;  %v661_v47 = vrot.slane %v400_v39, 1 }
  0x4d   : > { %v2388_v13 = vpop.eup %2387  ;;  %v1417_v9 = vmul.f32 %v2386_v38, %v2996_v46  ;;  %v1121_v48 = vadd.f32 %v2965_v63, %v1053_v56  ;;  %v956_v2 = vrot.slane %v3168_v24, 2  ;;  %v612_v27 = vadd.f32 %v580_v28, %v544_v26  ;;  %v3238_v26 = vld [vmem:[%s2736_s10 + $0x68] sm:$0xff] }
  0x4e   : > { %v1418_v12 = vmul.f32 %v2388_v13, %v2999_v51  ;;  %v1188_v23 = vadd.f32 %v1156_v52, %v1120_v22  ;;  %v613_v62 = vadd.f32 %v581_v33, %v545_v1  ;;  %v3199_v60 = vsel %vm682_vm0, %v660_v59, %v661_v47  ;;  %v3235_v22 = vld [vmem:[%s2736_s10 + $0x60] sm:$0xff] }
  0x4f   : > { %v1189_v61 = vadd.f32 %v1157_v8, %v1121_v48  ;;  %v3203_v34 = vsel %vm682_vm0, %v659_v36, %v660_v59  ;;  %v957_v46 = vrot.slane %v3171_v25, 2  ;;  %v773_v51 = vadd.f32 %v3029_v20, %v612_v27 }
  0x50   : > { %v1449_v63 = vpack.c.bf16 %v1418_v12, %v1417_v9  ;;  %v3207_v58 = vadd.f32 %v2983_v16, %v1188_v23  ;;  %v774_v52 = vadd.f32 %v3033_v21, %v613_v62  ;;  %v877_v7 = vmul.f32 %v2855_v55, %v3203_v34 }
  0x51   : > { %v3212_v8 = vadd.f32 %v2983_v16, %v1189_v61  ;;  %v878_v14 = vmul.f32 %v2855_v55, %v3199_v60  ;;  %v958_v53 = vrot.slane %v400_v39, 2  ;;  %v841_v56 = vadd.f32 %v3046_v18, %v773_v51 }
  0x52   : > { %2300 = vmatprep.mubr.bf16.mxu0 %v1449_v63  ;;  %v1259_v23 = vsub.f32 0.0, %v3207_v58  ;;  %v842_v20 = vadd.f32 %v3049_v37, %v774_v52  ;;  %v3223_v61 = vsel %vm977_vm1, %v956_v2, %v957_v46  ;;  %v430_v28 = vmul.f32 %v2803_v30, %v2766_v17  ;;  %v379_v2 = vld [vmem:[%s2736_s10 + $0x70] sm:$0xff] }
  0x53   : > { %v2390_v62 = vpop.eup %2389  ;;  %v1260_v21 = vsub.f32 0.0, %v3212_v8  ;;  %v3228_v27 = vsel %vm977_vm1, %v957_v46, %v958_v53  ;;  %v1172_v39 = vmul.f32 %v2922_v43, %v3223_v61  ;;  %v909_v36 = vadd.f32 %v877_v7, %v841_v56 }
  0x54   : > { %v2392_v18 = vpop.eup %2391  ;;  %v1369_v37 = vadd.f32 1.0, %v2390_v62  ;;  %v1293_v33 = vmul.f32 1.442695, %v1259_v23  ;;  %v910_v38 = vadd.f32 %v878_v14, %v842_v20  ;;  %v1173_v13 = vmul.f32 %v2922_v43, %v3228_v27 }
  0x55   : > { %v1370_v1 = vadd.f32 1.0, %v2392_v18  ;;  %v1295_v59 = vmul.f32 1.442695, %v1260_v21  ;;  %v431_v9 = vmul.f32 %v2803_v30, %v2800_v29  ;;  %v1068_v17 = vadd.f32 %v3088_v0, %v909_v36 }
  0x56   : > { %2393 = vrcp.f32 %v1369_v37  ;;  %v1069_v48 = vadd.f32 %v3092_v35, %v910_v38  ;;  %v498_v47 = vmul.f32 %v2806_v31, %v3101_v3  ;;  %v499_v12 = vmul.f32 %v2806_v31, %v3111_v19 }
  0x57   : > { %2395 = vrcp.f32 %v1370_v1  ;;  %v566_v46 = vmul.f32 %v2809_v32, %v3235_v22  ;;  %v567_v63 = vmul.f32 %v2809_v32, %v3238_v26  ;;  %v1136_v29 = vadd.f32 %v3108_v15, %v1068_v17 }
  0x58   : > { %2397 = vpow2.f32 %v1293_v33  ;;  %v1137_v0 = vadd.f32 %v3114_v45, %v1069_v48  ;;  %v530_v35 = vadd.f32 %v498_v47, %v430_v28  ;;  %v531_v51 = vadd.f32 %v499_v12, %v431_v9 }
  0x59   : > { %2399 = vpow2.f32 %v1295_v59  ;;  %v638_v52 = vrot.slane %v3235_v22, 1  ;;  %v639_v7 = vrot.slane %v3238_v26, 1  ;;  %v1204_v14 = vadd.f32 %v1172_v39, %v1136_v29 }
  0x5a   : > { %v1205_v53 = vadd.f32 %v1173_v13, %v1137_v0  ;;  %v598_v23 = vadd.f32 %v566_v46, %v530_v35  ;;  %v640_v56 = vrot.slane %v379_v2, 1  ;;  %v599_v20 = vadd.f32 %v567_v63, %v531_v51 }
  0x5b   : > { %v3261_v62 = vsel %vm682_vm0, %v638_v52, %v639_v7  ;;  %v795_v15 = vmul.f32 %v2852_v54, %v3143_v41  ;;  %v796_v45 = vmul.f32 %v2852_v54, %v3139_v10  ;;  %v3268_v21 = vadd.f32 %v2983_v16, %v1204_v14 }
  0x5c   : > { %v3271_v28 = vadd.f32 %v2983_v16, %v1205_v53  ;;  %v3275_v39 = vsel %vm682_vm0, %v639_v7, %v640_v56  ;;  %v759_v18 = vadd.f32 %v2874_v5, %v598_v23  ;;  %v760_v37 = vadd.f32 %v2877_v6, %v599_v20 }
  0x5d   : > { %v863_v33 = vmul.f32 %v2855_v55, %v3261_v62  ;;  %v864_v36 = vmul.f32 %v2855_v55, %v3275_v39  ;;  %v935_v38 = vrot.slane %v3235_v22, 2  ;;  %v1275_v1 = vsub.f32 0.0, %v3268_v21 }
  0x5e   : > { %v1276_v59 = vsub.f32 0.0, %v3271_v28  ;;  %v827_v13 = vadd.f32 %v795_v15, %v759_v18  ;;  %v936_v9 = vrot.slane %v3238_v26, 2  ;;  %v828_v17 = vadd.f32 %v796_v45, %v760_v37  ;;  %v3308_v15 = vld [vmem:[%s2736_s10 + $0x120] sm:$0xff]  ;;  %v3311_v45 = vld [vmem:[%s2736_s10 + $0x128] sm:$0xff]  ;;  %v4251_v18 = vld [vmem:[#allocation5_spill] sm:$0xff] }
  0x5f   : > { %v937_v48 = vrot.slane %v379_v2, 2  ;;  %v1090_v5 = vmul.f32 %v2918_v42, %v3165_v11  ;;  %v1091_v6 = vmul.f32 %v2918_v42, %v3161_v57  ;;  %v1325_v12 = vmul.f32 1.442695, %v1275_v1 }
  0x60   : > { %v2394_v47 = vpop.eup %2393  ;;  %v1327_v46 = vmul.f32 1.442695, %v1276_v59  ;;  %v895_v63 = vadd.f32 %v863_v33, %v827_v13  ;;  %v3293_v29 = vsel %vm977_vm1, %v935_v38, %v936_v9  ;;  %v896_v2 = vadd.f32 %v864_v36, %v828_v17  ;;  %v4252_v38 = vld [vmem:[#allocation6_spill] sm:$0xff]  ;;  %v403_v59 = vld [vmem:[%s2736_s10 + $0x130] sm:$0xff] }
  0x61   : > { %v2396_v0 = vpop.eup %2395  ;;  %v1433_v35 = vmul.f32 %v2394_v47, %v3132_v44  ;;  %v3298_v51 = vsel %vm977_vm1, %v936_v9, %v937_v48  ;;  %v1158_v52 = vmul.f32 %v2922_v43, %v3293_v29  ;;  %2401 = vpow2.f32 %v1325_v12 }
  0x62   : > { %v2398_v7 = vpop.eup %2397  ;;  %v1434_v14 = vmul.f32 %v2396_v0, %v3135_v40  ;;  %v1054_v53 = vadd.f32 %v2942_v49, %v895_v63  ;;  %v1159_v23 = vmul.f32 %v2922_v43, %v3298_v51  ;;  %2403 = vpow2.f32 %v1327_v46 }
  0x63   : > { %v2400_v56 = vpop.eup %2399  ;;  %v1355_v44 = vadd.f32 1.0, %v2398_v7  ;;  %v1055_v20 = vadd.f32 %v2945_v50, %v896_v2  ;;  %v446_v37 = vmul.f32 %v2803_v30, %v4251_v18  ;;  %v447_v49 = vmul.f32 %v2803_v30, %v4252_v38  ;;  %v4253_v18 = vld [vmem:[#allocation11_spill] sm:$0xff] }
  0x64   : > { %v1457_v40 = vpack.c.bf16 %v1434_v14, %v1433_v35  ;;  %v1356_v33 = vadd.f32 1.0, %v2400_v56  ;;  %v1122_v36 = vadd.f32 %v1090_v5, %v1054_v53  ;;  %v514_v13 = vmul.f32 %v2806_v31, %v3168_v24 }
  0x65   : > { %2405 = vrcp.f32 %v1355_v44  ;;  %v1123_v1 = vadd.f32 %v1091_v6, %v1055_v20  ;;  %v515_v50 = vmul.f32 %v2806_v31, %v3171_v25  ;;  %v582_v17 = vmul.f32 %v2809_v32, %v3308_v15 }
  0x66   : > { %2316 = vmatprep.mubr.bf16.mxu1 %v1457_v40  ;;  %2407 = vrcp.f32 %v1356_v33  ;;  %v1190_v9 = vadd.f32 %v1158_v52, %v1122_v36  ;;  %v583_v48 = vmul.f32 %v2809_v32, %v3311_v45  ;;  %v546_v47 = vadd.f32 %v514_v13, %v446_v37  ;;  %v4254_v40 = vld [vmem:[#allocation12_spill] sm:$0xff] }
  0x67   : > { %v1191_v5 = vadd.f32 %v1159_v23, %v1123_v1  ;;  %v547_v12 = vadd.f32 %v515_v50, %v447_v49  ;;  %v662_v6 = vrot.slane %v3308_v15, 1  ;;  %v663_v63 = vrot.slane %v3311_v45, 1 }
  0x68   : > { %v3328_v46 = vadd.f32 %v2983_v16, %v1190_v9  ;;  %v664_v0 = vrot.slane %v403_v59, 1  ;;  %v811_v35 = vmul.f32 %v2852_v54, %v3203_v34  ;;  %v614_v52 = vadd.f32 %v582_v17, %v546_v47 }
  0x69   : > { %v3334_v2 = vadd.f32 %v2983_v16, %v1191_v5  ;;  %v615_v7 = vadd.f32 %v583_v48, %v547_v12  ;;  %v812_v14 = vmul.f32 %v2852_v54, %v3199_v60  ;;  %v3345_v56 = vsel %vm682_vm0, %v662_v6, %v663_v63 }
  0x6a   : > { %v1261_v53 = vsub.f32 0.0, %v3328_v46  ;;  %v3341_v23 = vsel %vm682_vm0, %v663_v63, %v664_v0  ;;  %v959_v44 = vrot.slane %v3308_v15, 2  ;;  %v775_v37 = vadd.f32 %v4253_v18, %v614_v52  ;;  %v4255_v18 = vld [vmem:[#allocation17_spill] sm:$0xff] }
  0x6b   : > { %v1262_v20 = vsub.f32 0.0, %v3334_v2  ;;  %v776_v33 = vadd.f32 %v4254_v40, %v615_v7  ;;  %v879_v36 = vmul.f32 %v2855_v55, %v3345_v56  ;;  %v2402_v38 = vpop.eup %2401  ;;  %v880_v1 = vmul.f32 %v2855_v55, %v3341_v23  ;;  %v4256_v40 = vld [vmem:[#allocation18_spill] sm:$0xff] }
  0x6c   : > { %v1297_v49 = vmul.f32 1.442695, %v1261_v53  ;;  %v960_v13 = vrot.slane %v3311_v45, 2  ;;  %v961_v50 = vrot.slane %v403_v59, 2  ;;  %v2404_v9 = vpop.eup %2403  ;;  %v1371_v17 = vadd.f32 1.0, %v2402_v38  ;;  %v3378_v38 = vld [vmem:[%s2736_s10 + $0x80] sm:$0xff] }
  0x6d   : > { %v1299_v48 = vmul.f32 1.442695, %v1262_v20  ;;  %v843_v5 = vadd.f32 %v811_v35, %v775_v37  ;;  %v844_v47 = vadd.f32 %v812_v14, %v776_v33  ;;  %v1372_v12 = vadd.f32 1.0, %v2404_v9 }
  0x6e   : > { %2409 = vpow2.f32 %v1297_v49  ;;  %v3358_v6 = vsel %vm977_vm1, %v960_v13, %v961_v50  ;;  %v3362_v63 = vsel %vm977_vm1, %v959_v44, %v960_v13  ;;  %v1106_v35 = vmul.f32 %v2918_v42, %v3223_v61 }
  0x6f   : > { %v2406_v0 = vpop.eup %2405  ;;  %2411 = vrcp.f32 %v1371_v17  ;;  %v911_v59 = vadd.f32 %v879_v36, %v843_v5  ;;  %v912_v52 = vadd.f32 %v880_v1, %v844_v47  ;;  %v1107_v53 = vmul.f32 %v2918_v42, %v3228_v27  ;;  %v3375_v36 = vld [vmem:[%s2736_s10 + $0x78] sm:$0xff]  ;;  %v382_v17 = vld [vmem:[%s2736_s10 + $0x88] sm:$0xff] }
  0x70   : > { %v2408_v7 = vpop.eup %2407  ;;  %v1419_v14 = vmul.f32 %v2406_v0, %v3207_v58  ;;  %2413 = vrcp.f32 %v1372_v12  ;;  %v1174_v44 = vmul.f32 %v2922_v43, %v3362_v63  ;;  %v1175_v58 = vmul.f32 %v2922_v43, %v3358_v6 }
  0x71   : > { %v1420_v20 = vmul.f32 %v2408_v7, %v3212_v8  ;;  %2415 = vpow2.f32 %v1299_v48  ;;  %v1070_v37 = vadd.f32 %v4255_v18, %v911_v59  ;;  %v1071_v33 = vadd.f32 %v4256_v40, %v912_v52 }
  0x72   : > { %v432_v49 = vmul.f32 %v2803_v30, %v3101_v3  ;;  %v433_v1 = vmul.f32 %v2803_v30, %v3111_v19  ;;  %v500_v8 = vmul.f32 %v2806_v31, %v3235_v22  ;;  %v501_v48 = vmul.f32 %v2806_v31, %v3238_v26 }
  0x73   : > { %v1450_v13 = vpack.c.bf16 %v1420_v20, %v1419_v14  ;;  %v1138_v50 = vadd.f32 %v1106_v35, %v1070_v37  ;;  %v1139_v9 = vadd.f32 %v1107_v53, %v1071_v33  ;;  %v568_v47 = vmul.f32 %v2809_v32, %v3375_v36  ;;  %v4257_v14 = vld [vmem:[#allocation3_spill] sm:$0xff] }
  0x74   : > { %v532_v5 = vadd.f32 %v500_v8, %v432_v49  ;;  %v569_v3 = vmul.f32 %v2809_v32, %v3378_v38  ;;  %v641_v12 = vrot.slane %v3375_v36, 1  ;;  %v533_v59 = vadd.f32 %v501_v48, %v433_v1 }
  0x75   : > { %2301 = vmatmul.mubr.bf16.vlgmr.msra.gmra.mrb[0].mxu0 %v1450_v13  ;;  %v1206_v19 = vadd.f32 %v1174_v44, %v1138_v50  ;;  %v1207_v0 = vadd.f32 %v1175_v58, %v1139_v9  ;;  %v642_v52 = vrot.slane %v3378_v38, 1  ;;  %v643_v7 = vrot.slane %v382_v17, 1 }
  0x76   : > { %v600_v35 = vadd.f32 %v568_v47, %v532_v5  ;;  %v729_v53 = vmul.f32 %v4257_v14, %v3143_v41  ;;  %v730_v20 = vmul.f32 %v4257_v14, %v3139_v10  ;;  %v601_v40 = vadd.f32 %v569_v3, %v533_v59 }
  0x77   : > { %v3402_v18 = vadd.f32 %v2983_v16, %v1206_v19  ;;  %v3405_v37 = vadd.f32 %v2983_v16, %v1207_v0  ;;  %v3409_v44 = vsel %vm682_vm0, %v641_v12, %v642_v52  ;;  %v3413_v58 = vsel %vm682_vm0, %v642_v52, %v643_v7 }
  0x78   : > { %v2410_v33 = vpop.eup %2409  ;;  %v761_v41 = vadd.f32 %v729_v53, %v600_v35  ;;  %v797_v10 = vmul.f32 %v2852_v54, %v3261_v62  ;;  %v798_v49 = vmul.f32 %v2852_v54, %v3275_v39  ;;  %v762_v9 = vadd.f32 %v730_v20, %v601_v40 }
  0x79   : > { %v2412_v1 = vpop.eup %2411  ;;  %v1357_v8 = vadd.f32 1.0, %v2410_v33  ;;  %v1277_v13 = vsub.f32 0.0, %v3402_v18  ;;  %v1278_v50 = vsub.f32 0.0, %v3405_v37  ;;  %v865_v3 = vmul.f32 %v2855_v55, %v3409_v44 }
  0x7a   : > { %v2414_v48 = vpop.eup %2413  ;;  %v1435_v5 = vmul.f32 %v2412_v1, %v3268_v21  ;;  %v829_v47 = vadd.f32 %v797_v10, %v761_v41  ;;  %v866_v12 = vmul.f32 %v2855_v55, %v3413_v58  ;;  %v830_v7 = vadd.f32 %v798_v49, %v762_v9 }
  0x7b   : > { %v2416_v19 = vpop.eup %2415  ;;  %v1436_v0 = vmul.f32 %v2414_v48, %v3271_v28  ;;  %2417 = vrcp.f32 %v1357_v8  ;;  %v1329_v59 = vmul.f32 1.442695, %v1277_v13  ;;  %v1331_v52 = vmul.f32 1.442695, %v1278_v50  ;;  %v4258_v28 = vld [vmem:[#allocation4_spill] sm:$0xff]  ;;  %v3444_v13 = vld [vmem:[%s2736_s10 + $0x138] sm:$0xff] }
  0x7c   : > { %v1358_v35 = vadd.f32 1.0, %v2416_v19  ;;  %v897_v53 = vadd.f32 %v865_v3, %v829_v47  ;;  %v938_v20 = vrot.slane %v3375_v36, 2  ;;  %v939_v40 = vrot.slane %v3378_v38, 2  ;;  %v3451_v48 = vld [vmem:[%s2736_s10 + $0x140] sm:$0xff]  ;;  %v406_v47 = vld [vmem:[%s2736_s10 + $0x148] sm:$0xff] }
  0x7d   : > { %v1458_v21 = vpack.c.bf16 %v1436_v0, %v1435_v5  ;;  %2419 = vpow2.f32 %v1329_v59  ;;  %v940_v33 = vrot.slane %v382_v17, 2  ;;  %v898_v41 = vadd.f32 %v866_v12, %v830_v7 }
  0x7e   : > { %2421 = vrcp.f32 %v1358_v35  ;;  %v1024_v10 = vmul.f32 %v4258_v28, %v3165_v11  ;;  %v1025_v1 = vmul.f32 %v4258_v28, %v3161_v57  ;;  %v3439_v8 = vsel %vm977_vm1, %v938_v20, %v939_v40 }
  0x7f   : > { %2317 = vmatmul.mubr.bf16.vlgmr.msra.gmra.mrb[0].mxu1 %v1458_v21  ;;  %2423 = vpow2.f32 %v1331_v52  ;;  %v3435_v49 = vsel %vm977_vm1, %v939_v40, %v940_v33  ;;  %v1092_v17 = vmul.f32 %v2918_v42, %v3293_v29  ;;  %v1093_v57 = vmul.f32 %v2918_v42, %v3298_v51 }
  0x80   : > { %v1056_v50 = vadd.f32 %v1024_v10, %v897_v53  ;;  %v1057_v11 = vadd.f32 %v1025_v1, %v898_v41  ;;  %v1160_v9 = vmul.f32 %v2922_v43, %v3439_v8  ;;  %v1161_v5 = vmul.f32 %v2922_v43, %v3435_v49 }
  0x81   : > { %v448_v3 = vmul.f32 %v2803_v30, %v3168_v24  ;;  %v449_v12 = vmul.f32 %v2803_v30, %v3171_v25  ;;  %v516_v19 = vmul.f32 %v2806_v31, %v3308_v15  ;;  %v517_v52 = vmul.f32 %v2806_v31, %v3311_v45 }
  0x82   : > { %v1124_v0 = vadd.f32 %v1092_v17, %v1056_v50  ;;  %v1125_v59 = vadd.f32 %v1093_v57, %v1057_v11  ;;  %v584_v35 = vmul.f32 %v2809_v32, %v3444_v13  ;;  %v585_v53 = vmul.f32 %v2809_v32, %v3451_v48 }
  0x83   : > { %v548_v7 = vadd.f32 %v516_v19, %v448_v3  ;;  %v665_v24 = vrot.slane %v3444_v13, 1  ;;  %v666_v20 = vrot.slane %v3451_v48, 1  ;;  %v549_v40 = vadd.f32 %v517_v52, %v449_v12 }
  0x84   : > { %v1192_v25 = vadd.f32 %v1160_v9, %v1124_v0  ;;  %v1193_v21 = vadd.f32 %v1161_v5, %v1125_v59  ;;  %v667_v33 = vrot.slane %v406_v47, 1  ;;  %v745_v17 = vmul.f32 %v4257_v14, %v3203_v34 }
  0x85   : > { %v2418_v41 = vpop.eup %2417  ;;  %v616_v10 = vadd.f32 %v584_v35, %v548_v7  ;;  %v3472_v1 = vsel %vm682_vm0, %v665_v24, %v666_v20  ;;  %v746_v50 = vmul.f32 %v4257_v14, %v3199_v60  ;;  %v617_v5 = vadd.f32 %v585_v53, %v549_v40 }
  0x86   : > { %v1421_v11 = vmul.f32 %v2418_v41, %v3328_v46  ;;  %v3480_v57 = vadd.f32 %v2983_v16, %v1192_v25  ;;  %v3483_v9 = vadd.f32 %v2983_v16, %v1193_v21  ;;  %v3487_v12 = vsel %vm682_vm0, %v666_v20, %v667_v33 }
  0x87   : > { %v2420_v3 = vpop.eup %2419  ;;  %v777_v19 = vadd.f32 %v745_v17, %v616_v10  ;;  %v813_v34 = vmul.f32 %v2852_v54, %v3345_v56  ;;  %v814_v60 = vmul.f32 %v2852_v54, %v3341_v23  ;;  %v778_v35 = vadd.f32 %v746_v50, %v617_v5 }
  0x88   : > { %v2422_v46 = vpop.eup %2421  ;;  %v1373_v0 = vadd.f32 1.0, %v2420_v3  ;;  %v1263_v59 = vsub.f32 0.0, %v3480_v57  ;;  %v1264_v52 = vsub.f32 0.0, %v3483_v9  ;;  %v881_v20 = vmul.f32 %v2855_v55, %v3472_v1 }
  0x89   : > { %v2424_v7 = vpop.eup %2423  ;;  %v1422_v53 = vmul.f32 %v2422_v46, %v3334_v2  ;;  %v845_v24 = vadd.f32 %v813_v34, %v777_v19  ;;  %v882_v25 = vmul.f32 %v2855_v55, %v3487_v12  ;;  %v846_v10 = vadd.f32 %v814_v60, %v778_v35  ;;  %v3517_v46 = vld [vmem:[%s2736_s10 + $0x90] sm:$0xff] }
  0x8a   : > { %v1374_v21 = vadd.f32 1.0, %v2424_v7  ;;  %2425 = vrcp.f32 %v1373_v0  ;;  %v1301_v40 = vmul.f32 1.442695, %v1263_v59  ;;  %v1303_v33 = vmul.f32 1.442695, %v1264_v52  ;;  %v3520_v0 = vld [vmem:[%s2736_s10 + $0x98] sm:$0xff] }
  0x8b   : > { %v1451_v41 = vpack.c.bf16 %v1422_v53, %v1421_v11  ;;  %v913_v17 = vadd.f32 %v881_v20, %v845_v24  ;;  %v962_v50 = vrot.slane %v3444_v13, 2  ;;  %v963_v2 = vrot.slane %v3451_v48, 2  ;;  %v385_v53 = vld [vmem:[%s2736_s10 + $0xa0] sm:$0xff] }
  0x8c   : > { %2427 = vrcp.f32 %v1374_v21  ;;  %v964_v5 = vrot.slane %v406_v47, 2  ;;  %v1040_v3 = vmul.f32 %v4258_v28, %v3223_v61  ;;  %v914_v19 = vadd.f32 %v882_v25, %v846_v10 }
  0x8d   : > { %2304 = vmatprep.mubr.bf16.mxu0 %v1451_v41  ;;  %2429 = vpow2.f32 %v1301_v40  ;;  %v1041_v11 = vmul.f32 %v4258_v28, %v3228_v27  ;;  %v1108_v34 = vmul.f32 %v2918_v42, %v3362_v63  ;;  %v3514_v47 = vsel %vm977_vm1, %v962_v50, %v963_v2 }
  0x8e   : > { %2431 = vpow2.f32 %v1303_v33  ;;  %v3510_v60 = vsel %vm977_vm1, %v963_v2, %v964_v5  ;;  %v1072_v61 = vadd.f32 %v1040_v3, %v913_v17  ;;  %v1109_v27 = vmul.f32 %v2918_v42, %v3358_v6 }
  0x8f   : > { %v1073_v59 = vadd.f32 %v1041_v11, %v914_v19  ;;  %v1176_v52 = vmul.f32 %v2922_v43, %v3514_v47  ;;  %v1177_v35 = vmul.f32 %v2922_v43, %v3510_v60  ;;  %v434_v24 = vmul.f32 %v2803_v30, %v3235_v22 }
  0x90   : > { %v1140_v7 = vadd.f32 %v1108_v34, %v1072_v61  ;;  %v435_v20 = vmul.f32 %v2803_v30, %v3238_v26  ;;  %v502_v25 = vmul.f32 %v2806_v31, %v3375_v36  ;;  %v503_v40 = vmul.f32 %v2806_v31, %v3378_v38 }
  0x91   : > { %v1141_v21 = vadd.f32 %v1109_v27, %v1073_v59  ;;  %v570_v33 = vmul.f32 %v2809_v32, %v3517_v46  ;;  %v571_v41 = vmul.f32 %v2809_v32, %v3520_v0  ;;  %v644_v22 = vrot.slane %v3517_v46, 1 }
  0x92   : > { %v1208_v10 = vadd.f32 %v1176_v52, %v1140_v7  ;;  %v534_v17 = vadd.f32 %v502_v25, %v434_v24  ;;  %v645_v50 = vrot.slane %v3520_v0, 1  ;;  %v535_v2 = vadd.f32 %v503_v40, %v435_v20 }
  0x93   : > { %v1209_v26 = vadd.f32 %v1177_v35, %v1141_v21  ;;  %v646_v5 = vrot.slane %v385_v53, 1  ;;  %v731_v3 = vmul.f32 %v4257_v14, %v3261_v62  ;;  %v732_v59 = vmul.f32 %v4257_v14, %v3275_v39 }
  0x94   : > { %v2426_v19 = vpop.eup %2425  ;;  %v3546_v11 = vadd.f32 %v2983_v16, %v1208_v10  ;;  %v602_v34 = vadd.f32 %v570_v33, %v534_v17  ;;  %v3550_v61 = vsel %vm682_vm0, %v644_v22, %v645_v50  ;;  %v603_v35 = vadd.f32 %v571_v41, %v535_v2 }
  0x95   : > { %v1437_v27 = vmul.f32 %v2426_v19, %v3402_v18  ;;  %v3556_v52 = vadd.f32 %v2983_v16, %v1209_v26  ;;  %v3560_v62 = vsel %vm682_vm0, %v645_v50, %v646_v5  ;;  %v799_v25 = vmul.f32 %v2852_v54, %v3409_v44 }
  0x96   : > { %v2428_v7 = vpop.eup %2427  ;;  %v1279_v24 = vsub.f32 0.0, %v3546_v11  ;;  %v763_v20 = vadd.f32 %v731_v3, %v602_v34  ;;  %v800_v39 = vmul.f32 %v2852_v54, %v3413_v58  ;;  %v764_v40 = vadd.f32 %v732_v59, %v603_v35 }
  0x97   : > { %v2430_v21 = vpop.eup %2429  ;;  %v1438_v18 = vmul.f32 %v2428_v7, %v3405_v37  ;;  %v1280_v16 = vsub.f32 0.0, %v3556_v52  ;;  %v867_v33 = vmul.f32 %v2855_v55, %v3550_v61  ;;  %v868_v50 = vmul.f32 %v2855_v55, %v3560_v62 }
  0x98   : > { %v2432_v41 = vpop.eup %2431  ;;  %v1359_v10 = vadd.f32 1.0, %v2430_v21  ;;  %v1333_v17 = vmul.f32 1.442695, %v1279_v24  ;;  %v831_v22 = vadd.f32 %v799_v25, %v763_v20  ;;  %v832_v3 = vadd.f32 %v800_v39, %v764_v40  ;;  %v3592_v39 = vld [vmem:[%s2736_s10 + $0x150] sm:$0xff]  ;;  %v3595_v21 = vld [vmem:[%s2736_s10 + $0x158] sm:$0xff] }
  0x99   : > { %v1459_v26 = vpack.c.bf16 %v1438_v18, %v1437_v27  ;;  %v1360_v2 = vadd.f32 1.0, %v2432_v41  ;;  %v1335_v5 = vmul.f32 1.442695, %v1280_v16  ;;  %v941_v37 = vrot.slane %v3517_v46, 2  ;;  %v409_v41 = vld [vmem:[%s2736_s10 + $0x160] sm:$0xff] }
  0x9a   : > { %2433 = vrcp.f32 %v1359_v10  ;;  %v899_v19 = vadd.f32 %v867_v33, %v831_v22  ;;  %v942_v34 = vrot.slane %v3520_v0, 2  ;;  %v900_v59 = vadd.f32 %v868_v50, %v832_v3 }
  0x9b   : > { %2320 = vmatprep.mubr.bf16.mxu1 %v1459_v26  ;;  %2435 = vrcp.f32 %v1360_v2  ;;  %v943_v35 = vrot.slane %v385_v53, 2  ;;  %v1026_v7 = vmul.f32 %v4258_v28, %v3293_v29  ;;  %v1027_v24 = vmul.f32 %v4258_v28, %v3298_v51 }
  0x9c   : > { %2437 = vpow2.f32 %v1333_v17  ;;  %v3579_v27 = vsel %vm977_vm1, %v941_v37, %v942_v34  ;;  %v1094_v20 = vmul.f32 %v2918_v42, %v3439_v8  ;;  %v1095_v29 = vmul.f32 %v2918_v42, %v3435_v49 }
  0x9d   : > { %2439 = vpow2.f32 %v1335_v5  ;;  %v3587_v25 = vsel %vm977_vm1, %v942_v34, %v943_v35  ;;  %v1058_v53 = vadd.f32 %v1026_v7, %v899_v19  ;;  %v1059_v18 = vadd.f32 %v1027_v24, %v900_v59  ;;  %v3623_v7 = vld [vmem:[%s4204_s2] ss:$0 sm:$0xff] }
  0x9e   : > { %v1162_v51 = vmul.f32 %v2922_v43, %v3579_v27  ;;  %v1163_v16 = vmul.f32 %v2922_v43, %v3587_v25  ;;  %v450_v40 = vmul.f32 %v2803_v30, %v3308_v15  ;;  %v451_v10 = vmul.f32 %v2803_v30, %v3311_v45 }
  0x9f   : > { %v1126_v33 = vadd.f32 %v1094_v20, %v1058_v53  ;;  %v518_v17 = vmul.f32 %v2806_v31, %v3444_v13  ;;  %v519_v22 = vmul.f32 %v2806_v31, %v3451_v48  ;;  %v1127_v50 = vadd.f32 %v1095_v29, %v1059_v18 }
  0xa0   : > { %v586_v26 = vmul.f32 %v2809_v32, %v3592_v39  ;;  %v587_v2 = vmul.f32 %v2809_v32, %v3595_v21  ;;  %v668_v15 = vrot.slane %v3592_v39, 1  ;;  %v669_v45 = vrot.slane %v3595_v21, 1 }
  0xa1   : > { %v1194_v5 = vadd.f32 %v1162_v51, %v1126_v33  ;;  %v550_v3 = vadd.f32 %v518_v17, %v450_v40  ;;  %v551_v19 = vadd.f32 %v519_v22, %v451_v10  ;;  %v1195_v37 = vadd.f32 %v1163_v16, %v1127_v50 }
  0xa2   : > { %v670_v34 = vrot.slane %v409_v41, 1  ;;  %v747_v59 = vmul.f32 %v4257_v14, %v3345_v56  ;;  %v748_v35 = vmul.f32 %v4257_v14, %v3341_v23  ;;  %v3630_v29 = vsel %vm682_vm0, %v668_v15, %v669_v45 }
  0xa3   : > { %v3626_v24 = vadd.f32 %v3623_v7, %v1194_v5  ;;  %v618_v20 = vadd.f32 %v586_v26, %v550_v3  ;;  %v619_v53 = vadd.f32 %v587_v2, %v551_v19  ;;  %v3633_v56 = vadd.f32 %v3623_v7, %v1195_v37 }
  0xa4   : > { %v2434_v18 = vpop.eup %2433  ;;  %v3637_v23 = vsel %vm682_vm0, %v669_v45, %v670_v34  ;;  %v815_v51 = vmul.f32 %v2852_v54, %v3472_v1  ;;  %v816_v16 = vmul.f32 %v2852_v54, %v3487_v12  ;;  %v883_v15 = vmul.f32 %v2855_v55, %v3630_v29 }
  0xa5   : > { %v2436_v40 = vpop.eup %2435  ;;  %v1423_v33 = vmul.f32 %v2434_v18, %v3480_v57  ;;  %v1265_v10 = vsub.f32 0.0, %v3626_v24  ;;  %v779_v17 = vadd.f32 %v747_v59, %v618_v20  ;;  %v780_v22 = vadd.f32 %v748_v35, %v619_v53 }
  0xa6   : > { %v2438_v50 = vpop.eup %2437  ;;  %v1424_v26 = vmul.f32 %v2436_v40, %v3483_v9  ;;  %v1266_v2 = vsub.f32 0.0, %v3633_v56  ;;  %v884_v5 = vmul.f32 %v2855_v55, %v3637_v23  ;;  %v965_v35 = vrot.slane %v3592_v39, 2 }
  0xa7   : > { %v2440_v3 = vpop.eup %2439  ;;  %v1375_v19 = vadd.f32 1.0, %v2438_v50  ;;  %v1305_v45 = vmul.f32 1.442695, %v1265_v10  ;;  %v847_v37 = vadd.f32 %v815_v51, %v779_v17  ;;  %v848_v57 = vadd.f32 %v816_v16, %v780_v22  ;;  %v3673_v50 = vld [vmem:[%s2736_s10 + $0xb0] sm:$0xff] }
  0xa8   : > { %v1452_v34 = vpack.c.bf16 %v1424_v26, %v1423_v33  ;;  %v1376_v18 = vadd.f32 1.0, %v2440_v3  ;;  %v1307_v59 = vmul.f32 1.442695, %v1266_v2  ;;  %v966_v53 = vrot.slane %v3595_v21, 2 }
  0xa9   : > { %2441 = vrcp.f32 %v1375_v19  ;;  %v915_v9 = vadd.f32 %v883_v15, %v847_v37  ;;  %v916_v20 = vadd.f32 %v884_v5, %v848_v57  ;;  %v967_v40 = vrot.slane %v409_v41, 2 }
  0xaa   : > { %2305 = vmatmul.mubr.bf16.gmra.mrb[4].mxu0 %v1452_v34  ;;  %2443 = vrcp.f32 %v1376_v18  ;;  %v1042_v10 = vmul.f32 %v4258_v28, %v3362_v63  ;;  %v1043_v51 = vmul.f32 %v4258_v28, %v3358_v6  ;;  %v3659_v16 = vsel %vm977_vm1, %v965_v35, %v966_v53  ;;  %v3670_v6 = vld [vmem:[%s2736_s10 + $0xa8] sm:$0xff] }
  0xab   : > { %2445 = vpow2.f32 %v1305_v45  ;;  %v1110_v33 = vmul.f32 %v2918_v42, %v3514_v47  ;;  %v1111_v17 = vmul.f32 %v2918_v42, %v3510_v60  ;;  %v3667_v41 = vsel %vm977_vm1, %v966_v53, %v967_v40  ;;  %v388_v45 = vld [vmem:[%s2736_s10 + $0xb8] sm:$0xff] }
  0xac   : > { %2447 = vpow2.f32 %v1307_v59  ;;  %v1074_v63 = vadd.f32 %v1042_v10, %v915_v9  ;;  %v1075_v22 = vadd.f32 %v1043_v51, %v916_v20  ;;  %v1178_v26 = vmul.f32 %v2922_v43, %v3659_v16 }
  0xad   : > { %v1179_v2 = vmul.f32 %v2922_v43, %v3667_v41  ;;  %v436_v15 = vmul.f32 %v2803_v30, %v3375_v36  ;;  %v437_v5 = vmul.f32 %v2803_v30, %v3378_v38  ;;  %v504_v37 = vmul.f32 %v2806_v31, %v3517_v46 }
  0xae   : > { %v1142_v3 = vadd.f32 %v1110_v33, %v1074_v63  ;;  %v1143_v19 = vadd.f32 %v1111_v17, %v1075_v22  ;;  %v505_v57 = vmul.f32 %v2806_v31, %v3520_v0  ;;  %v572_v34 = vmul.f32 %v2809_v32, %v3670_v6 }
  0xaf   : > { %v573_v18 = vmul.f32 %v2809_v32, %v3673_v50  ;;  %v647_v36 = vrot.slane %v3670_v6, 1  ;;  %v648_v59 = vrot.slane %v3673_v50, 1  ;;  %v536_v9 = vadd.f32 %v504_v37, %v436_v15 }
  0xb0   : > { %v1210_v38 = vadd.f32 %v1178_v26, %v1142_v3  ;;  %v1211_v35 = vadd.f32 %v1179_v2, %v1143_v19  ;;  %v537_v20 = vadd.f32 %v505_v57, %v437_v5  ;;  %v649_v53 = vrot.slane %v388_v45, 1 }
  0xb1   : > { %v3696_v40 = vsel %vm682_vm0, %v647_v36, %v648_v59  ;;  %v733_v10 = vmul.f32 %v4257_v14, %v3409_v44  ;;  %v734_v51 = vmul.f32 %v4257_v14, %v3413_v58  ;;  %v604_v63 = vadd.f32 %v572_v34, %v536_v9 }
  0xb2   : > { %4259 = vst [vmem:[#allocation5_spill] sm:$0xff] %v3696_v40  ;;  %v3703_v33 = vadd.f32 %v3623_v7, %v1210_v38  ;;  %v3706_v17 = vadd.f32 %v3623_v7, %v1211_v35  ;;  %v605_v22 = vadd.f32 %v573_v18, %v537_v20  ;;  %v3710_v2 = vsel %vm682_vm0, %v648_v59, %v649_v53 }
  0xb3   : > { %v2442_v26 = vpop.eup %2441  ;;  %v801_v15 = vmul.f32 %v2852_v54, %v3550_v61  ;;  %v802_v44 = vmul.f32 %v2852_v54, %v3560_v62  ;;  %v869_v58 = vmul.f32 %v2855_v55, %v3696_v40  ;;  %v765_v57 = vadd.f32 %v733_v10, %v604_v63 }
  0xb4   : > { %4260 = vst [vmem:[#allocation6_spill] sm:$0xff] %v3703_v33  ;;  %v2444_v5 = vpop.eup %2443  ;;  %v1439_v3 = vmul.f32 %v2442_v26, %v3546_v11  ;;  %v1281_v19 = vsub.f32 0.0, %v3703_v33  ;;  %v1282_v37 = vsub.f32 0.0, %v3706_v17  ;;  %v766_v36 = vadd.f32 %v734_v51, %v605_v22 }
  0xb5   : > { %v2446_v34 = vpop.eup %2445  ;;  %v1440_v18 = vmul.f32 %v2444_v5, %v3556_v52  ;;  %v870_v59 = vmul.f32 %v2855_v55, %v3710_v2  ;;  %v944_v38 = vrot.slane %v3670_v6, 2  ;;  %v833_v40 = vadd.f32 %v801_v15, %v765_v57  ;;  %v412_v57 = vld [vmem:[%s2736_s10 + $0x178] sm:$0xff] }
  0xb6   : > { %v2448_v35 = vpop.eup %2447  ;;  %v1361_v9 = vadd.f32 1.0, %v2446_v34  ;;  %v1337_v20 = vmul.f32 1.442695, %v1281_v19  ;;  %v1339_v53 = vmul.f32 1.442695, %v1282_v37  ;;  %v834_v33 = vadd.f32 %v802_v44, %v766_v36 }
  0xb7   : > { %v1460_v11 = vpack.c.bf16 %v1440_v18, %v1439_v3  ;;  %v1362_v26 = vadd.f32 1.0, %v2448_v35  ;;  %v945_v10 = vrot.slane %v3673_v50, 2  ;;  %v901_v63 = vadd.f32 %v869_v58, %v833_v40  ;;  %v3741_v58 = vld [vmem:[%s2736_s10 + $0x168] sm:$0xff] }
  0xb8   : > { %2449 = vrcp.f32 %v1361_v9  ;;  %v946_v52 = vrot.slane %v388_v45, 2  ;;  %v1028_v51 = vmul.f32 %v4258_v28, %v3439_v8  ;;  %v902_v22 = vadd.f32 %v870_v59, %v834_v33 }
  0xb9   : > { %2321 = vmatmul.mubr.bf16.gmra.mrb[4].mxu1 %v1460_v11  ;;  %2451 = vrcp.f32 %v1362_v26  ;;  %v3730_v15 = vsel %vm977_vm1, %v944_v38, %v945_v10  ;;  %v1029_v44 = vmul.f32 %v4258_v28, %v3435_v49  ;;  %v1096_v8 = vmul.f32 %v2918_v42, %v3579_v27  ;;  %v3748_v49 = vld [vmem:[%s2736_s10 + $0x170] sm:$0xff] }
  0xba   : > { %4261 = vst [vmem:[#allocation11_spill] sm:$0xff] %v3730_v15  ;;  %2453 = vpow2.f32 %v1337_v20  ;;  %v3736_v40 = vsel %vm977_vm1, %v945_v10, %v946_v52  ;;  %v1060_v45 = vadd.f32 %v1028_v51, %v901_v63  ;;  %v1097_v5 = vmul.f32 %v2918_v42, %v3587_v25 }
  0xbb   : > { %4262 = vst [vmem:[#allocation12_spill] sm:$0xff] %v3736_v40  ;;  %2455 = vpow2.f32 %v1339_v53  ;;  %v1061_v33 = vadd.f32 %v1029_v44, %v902_v22  ;;  %v1164_v3 = vmul.f32 %v2922_v43, %v3730_v15  ;;  %v1165_v37 = vmul.f32 %v2922_v43, %v3736_v40 }
  0xbc   : > { %v1128_v19 = vadd.f32 %v1096_v8, %v1060_v45  ;;  %v452_v34 = vmul.f32 %v2803_v30, %v3444_v13  ;;  %v453_v18 = vmul.f32 %v2803_v30, %v3451_v48  ;;  %v520_v59 = vmul.f32 %v2806_v31, %v3592_v39 }
  0xbd   : > { %v1129_v36 = vadd.f32 %v1097_v5, %v1061_v33  ;;  %v521_v38 = vmul.f32 %v2806_v31, %v3595_v21  ;;  %v588_v35 = vmul.f32 %v2809_v32, %v3741_v58  ;;  %v589_v20 = vmul.f32 %v2809_v32, %v3748_v49 }
  0xbe   : > { %v1196_v9 = vadd.f32 %v1164_v3, %v1128_v19  ;;  %v671_v53 = vrot.slane %v3741_v58, 1  ;;  %v672_v13 = vrot.slane %v3748_v49, 1  ;;  %v552_v48 = vadd.f32 %v520_v59, %v452_v34 }
  0xbf   : > { %v1197_v11 = vadd.f32 %v1165_v37, %v1129_v36  ;;  %v553_v26 = vadd.f32 %v521_v38, %v453_v18  ;;  %v673_v10 = vrot.slane %v412_v57, 1  ;;  %v749_v51 = vmul.f32 %v4257_v14, %v3472_v1 }
  0xc0   : > { %v3768_v63 = vadd.f32 %v3623_v7, %v1196_v9  ;;  %v3772_v52 = vsel %vm682_vm0, %v671_v53, %v672_v13  ;;  %v750_v22 = vmul.f32 %v4257_v14, %v3487_v12  ;;  %v620_v45 = vadd.f32 %v588_v35, %v552_v48 }
  0xc1   : > { %v3779_v44 = vadd.f32 %v3623_v7, %v1197_v11  ;;  %v621_v8 = vadd.f32 %v589_v20, %v553_v26  ;;  %v3783_v33 = vsel %vm682_vm0, %v672_v13, %v673_v10  ;;  %v817_v19 = vmul.f32 %v2852_v54, %v3630_v29 }
  0xc2   : > { %4263 = vst [vmem:[#allocation17_spill] sm:$0xff] %v3768_v63  ;;  %v2450_v5 = vpop.eup %2449  ;;  %v1267_v3 = vsub.f32 0.0, %v3768_v63  ;;  %v818_v1 = vmul.f32 %v2852_v54, %v3637_v23  ;;  %v885_v12 = vmul.f32 %v2855_v55, %v3772_v52  ;;  %v781_v36 = vadd.f32 %v749_v51, %v620_v45 }
  0xc3   : > { %v2452_v37 = vpop.eup %2451  ;;  %v1425_v34 = vmul.f32 %v2450_v5, %v3626_v24  ;;  %v1268_v18 = vsub.f32 0.0, %v3779_v44  ;;  %v782_v59 = vadd.f32 %v750_v22, %v621_v8  ;;  %v886_v20 = vmul.f32 %v2855_v55, %v3783_v33 }
  0xc4   : > { %v2454_v38 = vpop.eup %2453  ;;  %v1426_v35 = vmul.f32 %v2452_v37, %v3633_v56  ;;  %v1309_v9 = vmul.f32 1.442695, %v1267_v3  ;;  %v968_v53 = vrot.slane %v3741_v58, 2  ;;  %v849_v26 = vadd.f32 %v817_v19, %v781_v36 }
  0xc5   : > { %v2456_v13 = vpop.eup %2455  ;;  %v1377_v11 = vadd.f32 1.0, %v2454_v38  ;;  %v1311_v48 = vmul.f32 1.442695, %v1268_v18  ;;  %v850_v10 = vadd.f32 %v818_v1, %v782_v59  ;;  %v969_v51 = vrot.slane %v3748_v49, 2 }
  0xc6   : > { %v1453_v63 = vpack.c.bf16 %v1426_v35, %v1425_v34  ;;  %v1378_v24 = vadd.f32 1.0, %v2456_v13  ;;  %2457 = vpow2.f32 %v1309_v9  ;;  %v917_v22 = vadd.f32 %v885_v12, %v849_v26  ;;  %v3828_v35 = vld [vmem:[%s2736_s10 + $0xc0] sm:$0xff] }
  0xc7   : > { %2459 = vrcp.f32 %v1377_v11  ;;  %v918_v45 = vadd.f32 %v886_v20, %v850_v10  ;;  %v970_v56 = vrot.slane %v412_v57, 2  ;;  %v3801_v8 = vsel %vm977_vm1, %v968_v53, %v969_v51  ;;  %v3833_v20 = vld [vmem:[%s2736_s10 + $0xc8] sm:$0xff]  ;;  %v4264_v10 = vld [vmem:[#allocation5_spill] sm:$0xff] }
  0xc8   : > { %2308 = vmatprep.mubr.bf16.mxu0 %v1453_v63  ;;  %2461 = vrcp.f32 %v1378_v24  ;;  %v1044_v5 = vmul.f32 %v4258_v28, %v3514_v47  ;;  %v1045_v3 = vmul.f32 %v4258_v28, %v3510_v60  ;;  %v1112_v57 = vmul.f32 %v2918_v42, %v3659_v16 }
  0xc9   : > { %2463 = vpow2.f32 %v1311_v48  ;;  %v3809_v19 = vsel %vm977_vm1, %v969_v51, %v970_v56  ;;  %v1113_v63 = vmul.f32 %v2918_v42, %v3667_v41  ;;  %v1180_v47 = vmul.f32 %v2922_v43, %v3801_v8  ;;  %v4265_v56 = vld [vmem:[#allocation10_spill] sm:$0xff] }
  0xca   : > { %v1076_v1 = vadd.f32 %v1044_v5, %v917_v22  ;;  %v1077_v12 = vadd.f32 %v1045_v3, %v918_v45  ;;  %v1181_v60 = vmul.f32 %v2922_v43, %v3809_v19  ;;  %v438_v37 = vmul.f32 %v2803_v30, %v3517_v46  ;;  %v4266_v3 = vld [vmem:[#allocation9_spill] sm:$0xff] }
  0xcb   : > { %v439_v34 = vmul.f32 %v2803_v30, %v3520_v0  ;;  %v506_v18 = vmul.f32 %v2806_v31, %v3670_v6  ;;  %v507_v36 = vmul.f32 %v2806_v31, %v3673_v50  ;;  %v574_v9 = vmul.f32 %v3828_v35, %v2809_v32 }
  0xcc   : > { %v1144_v59 = vadd.f32 %v1112_v57, %v1076_v1  ;;  %v1145_v38 = vadd.f32 %v1113_v63, %v1077_v12  ;;  %v575_v46 = vmul.f32 %v3833_v20, %v2809_v32  ;;  %v735_v13 = vmul.f32 %v4257_v14, %v3550_v61 }
  0xcd   : > { %v538_v53 = vadd.f32 %v506_v18, %v438_v37  ;;  %v539_v0 = vadd.f32 %v507_v36, %v439_v34  ;;  %v736_v11 = vmul.f32 %v4257_v14, %v3560_v62  ;;  %v803_v24 = vmul.f32 %v2852_v54, %v4264_v10 }
  0xce   : > { %v1212_v48 = vadd.f32 %v1180_v47, %v1144_v59  ;;  %v1213_v26 = vadd.f32 %v1181_v60, %v1145_v38  ;;  %v804_v51 = vmul.f32 %v2852_v54, %v3710_v2  ;;  %v871_v5 = vmul.f32 %v2855_v55, %v4265_v56  ;;  %v4269_v59 = vld [vmem:[#allocation6_spill] sm:$0xff] }
  0xcf   : > { %v606_v22 = vadd.f32 %v574_v9, %v538_v53  ;;  %v607_v45 = vadd.f32 %v575_v46, %v539_v0  ;;  %v872_v57 = vmul.f32 %v2855_v55, %v4266_v3  ;;  %v1030_v1 = vmul.f32 %v4258_v28, %v3579_v27 }
  0xd0   : > { %v2458_v61 = vpop.eup %2457  ;;  %v3850_v63 = vadd.f32 %v3623_v7, %v1212_v48  ;;  %v3853_v62 = vadd.f32 %v3623_v7, %v1213_v26  ;;  %v1031_v12 = vmul.f32 %v4258_v28, %v3587_v25  ;;  %v1098_v18 = vmul.f32 %v2918_v42, %v3730_v15  ;;  %v414_v15 = vld [vmem:[%s2736_s10 + $0x188] sm:$0xff] }
  0xd1   : > { %v2460_v47 = vpop.eup %2459  ;;  %v1363_v60 = vadd.f32 1.0, %v2458_v61  ;;  %v767_v37 = vadd.f32 %v735_v13, %v606_v22  ;;  %v768_v34 = vadd.f32 %v736_v11, %v607_v45  ;;  %v1099_v27 = vmul.f32 %v2918_v42, %v3736_v40  ;;  %v4270_v22 = vld [vmem:[#allocation16_spill] sm:$0xff]  ;;  %v413_v40 = vld [vmem:[%s2736_s10 + $0x180] sm:$0xff] }
  0xd2   : > { %4267 = vst [vmem:[#allocation18_spill] sm:$0xff] %v3850_v63  ;;  %4268 = vst [vmem:[#allocation3_spill] sm:$0xff] %v3853_v62  ;;  %v2462_v36 = vpop.eup %2461  ;;  %v1441_v38 = vmul.f32 %v2460_v47, %v4269_v59  ;;  %v1283_v9 = vsub.f32 0.0, %v3850_v63  ;;  %v1284_v46 = vsub.f32 0.0, %v3853_v62  ;;  %v1166_v45 = vmul.f32 %v2922_v43, %v4270_v22  ;;  %v4271_v62 = vld [vmem:[#allocation13_spill] sm:$0xff] }
  0xd3   : > { %v2464_v25 = vpop.eup %2463  ;;  %v1442_v53 = vmul.f32 %v2462_v36, %v3706_v17  ;;  %2465 = vrcp.f32 %v1363_v60  ;;  %v835_v0 = vadd.f32 %v803_v24, %v767_v37  ;;  %v836_v13 = vadd.f32 %v804_v51, %v768_v34 }
  0xd4   : > { %v1364_v11 = vadd.f32 1.0, %v2464_v25  ;;  %v1341_v48 = vmul.f32 1.442695, %v1283_v9  ;;  %v1343_v26 = vmul.f32 1.442695, %v1284_v46  ;;  %v1167_v63 = vmul.f32 %v2922_v43, %v4271_v62 }
  0xd5   : > { %v1461_v61 = vpack.c.bf16 %v1442_v53, %v1441_v38  ;;  %v903_v47 = vadd.f32 %v871_v5, %v835_v0  ;;  %v904_v59 = vadd.f32 %v872_v57, %v836_v13  ;;  %v454_v17 = vmul.f32 %v2803_v30, %v3592_v39  ;;  %v415_v57 = vld [vmem:[%s2736_s10 + $0x190] sm:$0xff] }
  0xd6   : > { %2467 = vrcp.f32 %v1364_v11  ;;  %v455_v24 = vmul.f32 %v2803_v30, %v3595_v21  ;;  %v522_v51 = vmul.f32 %v2806_v31, %v3741_v58  ;;  %v523_v37 = vmul.f32 %v2806_v31, %v3748_v49 }
  0xd7   : > { %2324 = vmatprep.mubr.bf16.mxu1 %v1461_v61  ;;  %2469 = vpow2.f32 %v1341_v48  ;;  %v1062_v60 = vadd.f32 %v1030_v1, %v903_v47  ;;  %v1063_v5 = vadd.f32 %v1031_v12, %v904_v59  ;;  %v3883_v34 = vmul.f32 %v2806_v31, %v413_v40 }
  0xd8   : > { %2471 = vpow2.f32 %v1343_v26  ;;  %v3886_v39 = vmul.f32 %v2806_v31, %v414_v15  ;;  %v554_v36 = vadd.f32 %v522_v51, %v454_v17  ;;  %v555_v9 = vadd.f32 %v523_v37, %v455_v24  ;;  %v4272_v17 = vld [vmem:[#allocation17_spill] sm:$0xff] }
  0xd9   : > { %v1130_v21 = vadd.f32 %v1098_v18, %v1062_v60  ;;  %v1131_v38 = vadd.f32 %v1099_v27, %v1063_v5  ;;  %v590_v46 = vmul.f32 %v2809_v32, %v413_v40  ;;  %v591_v1 = vmul.f32 %v2809_v32, %v414_v15 }
  0xda   : > { %v674_v12 = vrot.slane %v413_v40, 1  ;;  %v675_v25 = vrot.slane %v414_v15, 1  ;;  %v676_v53 = vrot.slane %v415_v57, 1  ;;  %v751_v48 = vmul.f32 %v4257_v14, %v3630_v29 }
  0xdb   : > { %v1198_v0 = vadd.f32 %v1166_v45, %v1130_v21  ;;  %v1199_v13 = vadd.f32 %v1167_v63, %v1131_v38  ;;  %v622_v11 = vadd.f32 %v590_v46, %v554_v36  ;;  %v623_v26 = vadd.f32 %v591_v1, %v555_v9 }
  0xdc   : > { %v3894_v61 = vsel %vm682_vm0, %v675_v25, %v676_v53  ;;  %v3898_v18 = vsel %vm682_vm0, %v674_v12, %v675_v25  ;;  %v752_v27 = vmul.f32 %v4257_v14, %v3637_v23  ;;  %v819_v59 = vmul.f32 %v2852_v54, %v3772_v52 }
  0xdd   : > { %v2466_v47 = vpop.eup %2465  ;;  %v3903_v45 = vadd.f32 %v3623_v7, %v1198_v0  ;;  %v3906_v63 = vadd.f32 %v3623_v7, %v1199_v13  ;;  %v783_v29 = vadd.f32 %v751_v48, %v622_v11  ;;  %v820_v60 = vmul.f32 %v2852_v54, %v3783_v33 }
  0xde   : > { %v1427_v24 = vmul.f32 %v2466_v47, %v4272_v17  ;;  %v784_v51 = vadd.f32 %v752_v27, %v623_v26  ;;  %v887_v23 = vmul.f32 %v2855_v55, %v3898_v18  ;;  %v888_v21 = vmul.f32 %v2855_v55, %v3894_v61 }
  0xdf   : > { %v1269_v5 = vsub.f32 0.0, %v3903_v45  ;;  %v1270_v37 = vsub.f32 0.0, %v3906_v63  ;;  %v851_v36 = vadd.f32 %v819_v59, %v783_v29  ;;  %v971_v46 = vrot.slane %v413_v40, 2 }
  0xe0   : > { %v2468_v38 = vpop.eup %2467  ;;  %v852_v9 = vadd.f32 %v820_v60, %v784_v51  ;;  %v972_v1 = vrot.slane %v414_v15, 2  ;;  %v973_v12 = vrot.slane %v415_v57, 2  ;;  %v1047_v57 = vmul.f32 %v4258_v28, %v3667_v41 }
  0xe1   : > { %v2470_v25 = vpop.eup %2469  ;;  %v1428_v53 = vmul.f32 %v2468_v38, %v3779_v44  ;;  %v1313_v0 = vmul.f32 1.442695, %v1269_v5  ;;  %v1315_v13 = vmul.f32 1.442695, %v1270_v37  ;;  %v919_v11 = vadd.f32 %v887_v23, %v851_v36 }
  0xe2   : > { %v2472_v48 = vpop.eup %2471  ;;  %v1379_v26 = vadd.f32 1.0, %v2470_v25  ;;  %v920_v27 = vadd.f32 %v888_v21, %v852_v9  ;;  %v3922_v47 = vsel %vm977_vm1, %v972_v1, %v973_v12  ;;  %v3926_v29 = vsel %vm977_vm1, %v971_v46, %v972_v1  ;;  %v2640_v21 = vld [vmem:[%s2736_s10 + $0xd8] sm:$0xff]  ;;  %v2641_v46 = vld [vmem:[%s2736_s10 + $0xe0] sm:$0xff] }
  0xe3   : > { %v1454_v40 = vpack.c.bf16 %v1428_v53, %v1427_v24  ;;  %v1380_v15 = vadd.f32 1.0, %v2472_v48  ;;  %2473 = vpow2.f32 %v1313_v0  ;;  %v1046_v44 = vmul.f32 %v4258_v28, %v3659_v16  ;;  %v4273_v0 = vld [vmem:[#allocation8_spill] sm:$0xff] }
  0xe4   : > { %2475 = vrcp.f32 %v1379_v26  ;;  %v1114_v59 = vmul.f32 %v2918_v42, %v3801_v8  ;;  %v1115_v17 = vmul.f32 %v2918_v42, %v3809_v19  ;;  %v1182_v51 = vmul.f32 %v2922_v43, %v3926_v29 }
  0xe5   : > { %2309 = vmatmul.mubr.bf16.gmra.mrb[8].mxu0 %v1454_v40  ;;  %2477 = vrcp.f32 %v1380_v15  ;;  %v1078_v24 = vadd.f32 %v1046_v44, %v919_v11  ;;  %v1183_v16 = vmul.f32 %v2922_v43, %v3922_v47  ;;  %v1079_v60 = vadd.f32 %v1047_v57, %v920_v27  ;;  %v4274_v11 = vld [vmem:[#allocation7_spill] sm:$0xff]  ;;  %v4276_v15 = vld [vmem:[#allocation12_spill] sm:$0xff] }
  0xe6   : > { %2479 = vpow2.f32 %v1315_v13  ;;  %v440_v41 = vmul.f32 %v2803_v30, %v3670_v6  ;;  %v441_v23 = vmul.f32 %v2803_v30, %v3673_v50  ;;  %v508_v37 = vmul.f32 %v3828_v35, %v2806_v31  ;;  %v4275_v27 = vld [vmem:[#allocation11_spill] sm:$0xff] }
  0xe7   : > { %v1146_v5 = vadd.f32 %v1114_v59, %v1078_v24  ;;  %v509_v36 = vmul.f32 %v3833_v20, %v2806_v31  ;;  %v576_v38 = vmul.f32 %v2640_v21, %v2809_v32  ;;  %v1147_v9 = vadd.f32 %v1115_v17, %v1079_v60  ;;  %v4279_v21 = vld [vmem:[#allocation18_spill] sm:$0xff] }
  0xe8   : > { %v577_v1 = vmul.f32 %v2641_v46, %v2809_v32  ;;  %v737_v6 = vmul.f32 %v4257_v14, %v4264_v10  ;;  %v738_v50 = vmul.f32 %v4257_v14, %v3710_v2  ;;  %v540_v25 = vadd.f32 %v508_v37, %v440_v41  ;;  %v4278_v37 = vld [vmem:[#allocation14_spill] sm:$0xff] }
  0xe9   : > { %v1214_v12 = vadd.f32 %v1182_v51, %v1146_v5  ;;  %v541_v53 = vadd.f32 %v509_v36, %v441_v23  ;;  %v805_v35 = vmul.f32 %v2852_v54, %v4265_v56  ;;  %v1215_v31 = vadd.f32 %v1183_v16, %v1147_v9  ;;  %v4277_v16 = vld [vmem:[#allocation15_spill] sm:$0xff] }
  0xea   : > { %v806_v20 = vmul.f32 %v2852_v54, %v4266_v3  ;;  %v873_v13 = vmul.f32 %v2855_v55, %v4273_v0  ;;  %v874_v48 = vmul.f32 %v2855_v55, %v4274_v11  ;;  %v608_v2 = vadd.f32 %v576_v38, %v540_v25 }
  0xeb   : > { %v3965_v10 = vadd.f32 %v3623_v7, %v1214_v12  ;;  %v609_v26 = vadd.f32 %v577_v1, %v541_v53  ;;  %v1032_v40 = vmul.f32 %v4258_v28, %v4275_v27  ;;  %v3970_v56 = vadd.f32 %v3623_v7, %v1215_v31  ;;  %v416_v53 = vld [vmem:[%s2736_s10 + $0x198] sm:$0xff] }
  0xec   : > { %v1033_v3 = vmul.f32 %v4258_v28, %v4276_v15  ;;  %v1100_v44 = vmul.f32 %v2918_v42, %v4270_v22  ;;  %v1101_v57 = vmul.f32 %v2918_v42, %v4271_v62  ;;  %v769_v24 = vadd.f32 %v737_v6, %v608_v2  ;;  %v417_v2 = vld [vmem:[%s2736_s10 + $0x1a0] sm:$0xff] }
  0xed   : > { %v2474_v59 = vpop.eup %2473  ;;  %v1285_v17 = vsub.f32 0.0, %v3965_v10  ;;  %v770_v51 = vadd.f32 %v738_v50, %v609_v26  ;;  %v1168_v60 = vmul.f32 %v2922_v43, %v4277_v16  ;;  %v1286_v5 = vsub.f32 0.0, %v3970_v56  ;;  %v4280_v50 = vld [vmem:[#allocation3_spill] sm:$0xff]  ;;  %v418_v26 = vld [vmem:[%s2736_s10 + $0x1a8] sm:$0xff] }
  0xee   : > { %v2476_v41 = vpop.eup %2475  ;;  %v1365_v23 = vadd.f32 1.0, %v2474_v59  ;;  %v1169_v36 = vmul.f32 %v2922_v43, %v4278_v37  ;;  %v456_v22 = vmul.f32 %v2803_v30, %v3741_v58  ;;  %v837_v46 = vadd.f32 %v805_v35, %v769_v24 }
  0xef   : > { %v2478_v62 = vpop.eup %2477  ;;  %v1443_v38 = vmul.f32 %v2476_v41, %v4279_v21  ;;  %v1345_v9 = vmul.f32 1.442695, %v1285_v17  ;;  %v838_v1 = vadd.f32 %v806_v20, %v770_v51  ;;  %v1347_v25 = vmul.f32 1.442695, %v1286_v5 }
  0xf0   : > { %v2480_v6 = vpop.eup %2479  ;;  %v1444_v12 = vmul.f32 %v2478_v62, %v4280_v50  ;;  %2481 = vrcp.f32 %v1365_v23  ;;  %v457_v31 = vmul.f32 %v2803_v30, %v3748_v49  ;;  %v905_v58 = vadd.f32 %v873_v13, %v837_v46 }
  0xf1   : > { %v1366_v0 = vadd.f32 1.0, %v2480_v6  ;;  %2483 = vpow2.f32 %v1345_v9  ;;  %v906_v11 = vadd.f32 %v874_v48, %v838_v1  ;;  %v556_v35 = vadd.f32 %v3883_v34, %v456_v22 }
  0xf2   : > { %v1462_v27 = vpack.c.bf16 %v1444_v12, %v1443_v38  ;;  %2485 = vpow2.f32 %v1347_v25  ;;  %v557_v20 = vadd.f32 %v3886_v39, %v457_v31  ;;  %v1064_v15 = vadd.f32 %v1032_v40, %v905_v58 }
  0xf3   : > { %2487 = vrcp.f32 %v1366_v0  ;;  %v1065_v59 = vadd.f32 %v1033_v3, %v906_v11  ;;  %v592_v17 = vmul.f32 %v2809_v32, %v416_v53  ;;  %v593_v30 = vmul.f32 %v2809_v32, %v417_v2 }
  0xf4   : > { %2325 = vmatmul.mubr.bf16.gmra.mrb[8].mxu1 %v1462_v27  ;;  %v677_v49 = vrot.slane %v416_v53, 1  ;;  %v678_v24 = vrot.slane %v417_v2, 1  ;;  %v679_v13 = vrot.slane %v418_v26, 1  ;;  %v1132_v48 = vadd.f32 %v1100_v44, %v1064_v15 }
  0xf5   : > { %v1133_v51 = vadd.f32 %v1101_v57, %v1065_v59  ;;  %v624_v16 = vadd.f32 %v592_v17, %v556_v35  ;;  %v753_v41 = vmul.f32 %v4257_v14, %v3772_v52  ;;  %v625_v34 = vadd.f32 %v593_v30, %v557_v20 }
  0xf6   : > { %v683_v39 = vsel %vm682_vm0, %v678_v24, %v679_v13  ;;  %v684_v40 = vsel %vm682_vm0, %v677_v49, %v678_v24  ;;  %v754_v3 = vmul.f32 %v4257_v14, %v3783_v33  ;;  %v1200_v32 = vadd.f32 %v1168_v60, %v1132_v48 }
  0xf7   : > { %v1201_v23 = vadd.f32 %v1169_v36, %v1133_v51  ;;  %v785_v5 = vadd.f32 %v753_v41, %v624_v16  ;;  %v821_v44 = vmul.f32 %v2852_v54, %v3898_v18  ;;  %v822_v52 = vmul.f32 %v2852_v54, %v3894_v61 }
  0xf8   : > { %v786_v57 = vadd.f32 %v754_v3, %v625_v34  ;;  %v889_v37 = vmul.f32 %v2855_v55, %v684_v40  ;;  %v890_v22 = vmul.f32 %v2855_v55, %v683_v39  ;;  %v4012_v62 = vadd.f32 %v3623_v7, %v1200_v32 }
  0xf9   : > { %v4015_v21 = vadd.f32 %v3623_v7, %v1201_v23  ;;  %v853_v14 = vadd.f32 %v821_v44, %v785_v5  ;;  %v974_v33 = vrot.slane %v416_v53, 2  ;;  %v975_v38 = vrot.slane %v417_v2, 2 }
  0xfa   : > { %v2482_v60 = vpop.eup %2481  ;;  %v854_v36 = vadd.f32 %v822_v52, %v786_v57  ;;  %v976_v18 = vrot.slane %v418_v26, 2  ;;  %v1048_v9 = vmul.f32 %v4258_v28, %v3801_v8  ;;  %v1271_v55 = vsub.f32 0.0, %v4012_v62 }
  0xfb   : > { %v2484_v54 = vpop.eup %2483  ;;  %v1429_v61 = vmul.f32 %v2482_v60, %v3903_v45  ;;  %v1272_v46 = vsub.f32 0.0, %v4015_v21  ;;  %v921_v1 = vadd.f32 %v889_v37, %v853_v14  ;;  %v979_v53 = vsel %vm977_vm1, %v974_v33, %v975_v38  ;;  %v4044_v33 = vld [vmem:[%s4206_s4] ss:$0 sm:$0xff] }
  0xfc   : > { %v2486_v6 = vpop.eup %2485  ;;  %v1381_v50 = vadd.f32 1.0, %v2484_v54  ;;  %v922_v12 = vadd.f32 %v890_v22, %v854_v36  ;;  %v978_v25 = vsel %vm977_vm1, %v975_v38, %v976_v18  ;;  %v1317_v8 = vmul.f32 1.442695, %v1271_v55 }
  0xfd   : > { %v2488_v31 = vpop.eup %2487  ;;  %v1382_v0 = vadd.f32 1.0, %v2486_v6  ;;  %v1319_v58 = vmul.f32 1.442695, %v1272_v46  ;;  %v1049_v45 = vmul.f32 %v4258_v28, %v3809_v19  ;;  %v1080_v2 = vadd.f32 %v1048_v9, %v921_v1 }
  0xfe   : > { %v1430_v11 = vmul.f32 %v2488_v31, %v3906_v63  ;;  %2489 = vrcp.f32 %v1381_v50  ;;  %v1116_v26 = vmul.f32 %v2918_v42, %v3926_v29  ;;  %v1117_v4 = vmul.f32 %v2918_v42, %v3922_v47 }
  0xff   : > { %2491 = vrcp.f32 %v1382_v0  ;;  %v1081_v27 = vadd.f32 %v1049_v45, %v922_v12  ;;  %v1184_v35 = vmul.f32 %v2922_v43, %v979_v53  ;;  %v1185_v59 = vmul.f32 %v2922_v43, %v978_v25 }
 0x100   : > { %v1455_v20 = vpack.c.bf16 %v1430_v11, %v1429_v61  ;;  %2493 = vpow2.f32 %v1317_v8  ;;  %v1148_v15 = vadd.f32 %v1116_v26, %v1080_v2 }
 0x101   : > { %2495 = vpow2.f32 %v1319_v58  ;;  %v1149_v28 = vadd.f32 %v1117_v4, %v1081_v27 }
 0x102   : > { %2312 = vmatprep.mubr.bf16.mxu0 %v1455_v20  ;;  %v1216_v19 = vadd.f32 %v1184_v35, %v1148_v15 }
 0x103   : > { %v1217_v63 = vadd.f32 %v1185_v59, %v1149_v28 }
 0x104   : > { %v1255_v17 = vadd.f32 %v3623_v7, %v1216_v19 }
 0x105   : > { %v1256_v29 = vadd.f32 %v3623_v7, %v1217_v63 }
 0x106   : > { %v1287_v30 = vsub.f32 0.0, %v1255_v17 }
 0x107   : > { %v1288_v49 = vsub.f32 0.0, %v1256_v29 }
 0x108   : > { %v2490_v24 = vpop.eup %2489  ;;  %v1349_v42 = vmul.f32 1.442695, %v1287_v30 }
 0x109   : > { %v2492_v47 = vpop.eup %2491  ;;  %v1445_v13 = vmul.f32 %v2490_v24, %v3965_v10  ;;  %v1351_v48 = vmul.f32 1.442695, %v1288_v49 }
 0x10a   : > { %v2494_v51 = vpop.eup %2493  ;;  %v1446_v43 = vmul.f32 %v2492_v47, %v3970_v56  ;;  %2497 = vpow2.f32 %v1349_v42 }
 0x10b   : > { %v2496_v16 = vpop.eup %2495  ;;  %v1367_v41 = vadd.f32 1.0, %v2494_v51  ;;  %2499 = vpow2.f32 %v1351_v48 }
 0x10c   : > { %v1463_v34 = vpack.c.bf16 %v1446_v43, %v1445_v13  ;;  %v1368_v39 = vadd.f32 1.0, %v2496_v16 }
 0x10d   : > { %2501 = vrcp.f32 %v1367_v41 }
 0x10e   : > { %2328 = vmatprep.mubr.bf16.mxu1 %v1463_v34  ;;  %2503 = vrcp.f32 %v1368_v39 }
 0x114   : > { %v2498_v7 = vpop.eup %2497 }
 0x115   : > { %v2500_v40 = vpop.eup %2499  ;;  %v1383_v3 = vadd.f32 1.0, %v2498_v7 }
 0x116   : > { %v1384_v32 = vadd.f32 1.0, %v2500_v40 }
 0x117   : > { %v2502_v23 = vpop.eup %2501  ;;  %2505 = vrcp.f32 %v1383_v3 }
 0x118   : > { %v2504_v10 = vpop.eup %2503  ;;  %v1431_v5 = vmul.f32 %v2502_v23, %v4012_v62  ;;  %2507 = vrcp.f32 %v1384_v32  ;;  %v4049_v62 = vld [vmem:[%s4207_s5] ss:$0 sm:$0xff] }
 0x119   : > { %v1432_v56 = vmul.f32 %v2504_v10, %v4015_v21 }
 0x11b   : > { %v1456_v44 = vpack.c.bf16 %v1432_v56, %v1431_v5 }
 0x11d   : > { %2313 = vmatmul.mubr.bf16.gmra.mrb[12].mxu0 %v1456_v44 }
 0x121   : > { %v2506_v57 = vpop.eup %2505 }
 0x122   : > { %v2508_v52 = vpop.eup %2507  ;;  %v1447_v37 = vmul.f32 %v2506_v57, %v1255_v17 }
 0x123   : > { %v1448_v22 = vmul.f32 %v2508_v52, %v1256_v29 }
 0x125   : > { %v1464_v14 = vpack.c.bf16 %v1448_v22, %v1447_v37 }
 0x127   : > { %2329 = vmatmul.mubr.bf16.gmra.mrb[12].mxu1 %v1464_v14 }
 0x148   : > { %v2302_v60 = vpop.f32.mrb[0].mxu0 }
 0x149   : > { %v1830_v21 = vmul.f32 %v2302_v60, %v4044_v33  ;;  %v1595_v36 = vpop.f32.mrb[1].mxu0 }
 0x14a   : > { %v1828_v38 = vmul.f32 %v4044_v33, %v1595_v36  ;;  %v2303_v18 = vpop.f32.mrb[2].mxu0 }
 0x14b   : > { %v4054_v9 = vadd.f32 %v4049_v62, %v1830_v21  ;;  %v1831_v54 = vmul.f32 %v2303_v18, %v4044_v33  ;;  %v1598_v61 = vpop.f32.mrb[3].mxu0 }
 0x14c   : > { %v4058_v55 = vadd.f32 %v4049_v62, %v1828_v38  ;;  %v1829_v46 = vmul.f32 %v4044_v33, %v1598_v61 }
 0x14d   : > { %v1901_v1 = vsub.f32 0.0, %v4054_v9  ;;  %v4063_v6 = vadd.f32 %v4049_v62, %v1831_v54 }
 0x14e   : > { %v1899_v50 = vsub.f32 0.0, %v4058_v55  ;;  %v4067_v12 = vadd.f32 %v4049_v62, %v1829_v46 }
 0x14f   : > { %v1935_v25 = vmul.f32 1.442695, %v1901_v1  ;;  %v1902_v53 = vsub.f32 0.0, %v4063_v6 }
 0x150   : > { %v1931_v31 = vmul.f32 1.442695, %v1899_v50  ;;  %v1900_v0 = vsub.f32 0.0, %v4067_v12 }
 0x151   : > { %2509 = vpow2.f32 %v1935_v25  ;;  %v1937_v8 = vmul.f32 1.442695, %v1902_v53 }
 0x152   : > { %v2318_v58 = vpop.f32.mrb[0].mxu1  ;;  %2511 = vpow2.f32 %v1931_v31  ;;  %v1933_v45 = vmul.f32 1.442695, %v1900_v0 }
 0x153   : > { %v1846_v11 = vmul.f32 %v2318_v58, %v4044_v33  ;;  %v1659_v2 = vpop.f32.mrb[1].mxu1  ;;  %2513 = vpow2.f32 %v1937_v8 }
 0x154   : > { %v1844_v26 = vmul.f32 %v4044_v33, %v1659_v2  ;;  %v2319_v27 = vpop.f32.mrb[2].mxu1  ;;  %2515 = vpow2.f32 %v1933_v45 }
 0x155   : > { %v1885_v4 = vadd.f32 %v4049_v62, %v1846_v11  ;;  %v1847_v35 = vmul.f32 %v2319_v27, %v4044_v33  ;;  %v1662_v20 = vpop.f32.mrb[3].mxu1 }
 0x156   : > { %v1883_v15 = vadd.f32 %v4049_v62, %v1844_v26  ;;  %v1845_v59 = vmul.f32 %v4044_v33, %v1662_v20 }
 0x157   : > { %v1917_v28 = vsub.f32 0.0, %v1885_v4  ;;  %v1886_v19 = vadd.f32 %v4049_v62, %v1847_v35 }
 0x158   : > { %v1915_v63 = vsub.f32 0.0, %v1883_v15  ;;  %v1884_v17 = vadd.f32 %v4049_v62, %v1845_v59 }
 0x159   : > { %v1967_v29 = vmul.f32 1.442695, %v1917_v28  ;;  %v1918_v30 = vsub.f32 0.0, %v1886_v19 }
 0x15a   : > { %v1963_v49 = vmul.f32 1.442695, %v1915_v63  ;;  %v1916_v24 = vsub.f32 0.0, %v1884_v17 }
 0x15b   : > { %v2510_v42 = vpop.eup %2509  ;;  %2517 = vpow2.f32 %v1967_v29  ;;  %v1969_v47 = vmul.f32 1.442695, %v1918_v30 }
 0x15c   : > { %v2512_v13 = vpop.eup %2511  ;;  %v1997_v48 = vadd.f32 1.0, %v2510_v42  ;;  %2519 = vpow2.f32 %v1963_v49  ;;  %v1965_v34 = vmul.f32 1.442695, %v1916_v24 }
 0x15d   : > { %v2514_v51 = vpop.eup %2513  ;;  %v1995_v43 = vadd.f32 1.0, %v2512_v13  ;;  %2521 = vpow2.f32 %v1969_v47 }
 0x15e   : > { %v2516_v16 = vpop.eup %2515  ;;  %2523 = vrcp.f32 %v1997_v48  ;;  %v1998_v41 = vadd.f32 1.0, %v2514_v51 }
 0x15f   : > { %2525 = vrcp.f32 %v1995_v43  ;;  %v1996_v39 = vadd.f32 1.0, %v2516_v16 }
 0x160   : > { %2527 = vrcp.f32 %v1998_v41 }
 0x161   : > { %2529 = vrcp.f32 %v1996_v39 }
 0x162   : > { %2531 = vpow2.f32 %v1965_v34 }
 0x165   : > { %v2518_v7 = vpop.eup %2517 }
 0x166   : > { %v2520_v40 = vpop.eup %2519  ;;  %v2013_v3 = vadd.f32 1.0, %v2518_v7 }
 0x167   : > { %v2522_v32 = vpop.eup %2521  ;;  %v2011_v23 = vadd.f32 1.0, %v2520_v40 }
 0x168   : > { %v2524_v10 = vpop.eup %2523  ;;  %2533 = vrcp.f32 %v2013_v3  ;;  %v2014_v5 = vadd.f32 1.0, %v2522_v32 }
 0x169   : > { %v2526_v56 = vpop.eup %2525  ;;  %v2061_v44 = vmul.f32 %v2524_v10, %v4054_v9  ;;  %2535 = vrcp.f32 %v2011_v23 }
 0x16a   : > { %v2528_v57 = vpop.eup %2527  ;;  %v2059_v52 = vmul.f32 %v2526_v56, %v4058_v55  ;;  %2537 = vrcp.f32 %v2014_v5 }
 0x16b   : > { %v2530_v37 = vpop.eup %2529  ;;  %2093 = vst [vmem:[%s4083_s18 + $0x10] sm:$0xff] %v2061_v44  ;;  %v2062_v22 = vmul.f32 %v2528_v57, %v4063_v6 }
 0x16c   : > { %v2532_v14 = vpop.eup %2531  ;;  %2091 = vst [vmem:[%s4083_s18] sm:$0xff] %v2059_v52  ;;  %v2060_v60 = vmul.f32 %v2530_v37, %v4067_v12 }
 0x16d   : > { %2094 = vst [vmem:[%s4083_s18 + $0x18] sm:$0xff] %v2062_v22  ;;  %v2012_v21 = vadd.f32 1.0, %v2532_v14 }
 0x16e   : > { %2092 = vst [vmem:[%s4083_s18 + $0x8] sm:$0xff] %v2060_v60 }
 0x16f   : > { %2539 = vrcp.f32 %v2012_v21 }
 0x172   : > { %v2534_v36 = vpop.eup %2533 }
 0x173   : > { %v2536_v38 = vpop.eup %2535  ;;  %v2077_v18 = vmul.f32 %v2534_v36, %v1885_v4 }
 0x174   : > { %v2538_v9 = vpop.eup %2537  ;;  %v2075_v54 = vmul.f32 %v2536_v38, %v1883_v15 }
 0x175   : > { %2109 = vst [vmem:[%s4083_s18 + $0x90] sm:$0xff] %v2077_v18  ;;  %v2078_v61 = vmul.f32 %v2538_v9, %v1886_v19 }
 0x176   : > { %2107 = vst [vmem:[%s4083_s18 + $0x80] sm:$0xff] %v2075_v54 }
 0x177   : > { %2110 = vst [vmem:[%s4083_s18 + $0x98] sm:$0xff] %v2078_v61 }
 0x179   : > { %v2540_v55 = vpop.eup %2539 }
 0x17a   : > { %v2076_v46 = vmul.f32 %v2540_v55, %v1884_v17 }
 0x17c   : > { %2108 = vst [vmem:[%s4083_s18 + $0x88] sm:$0xff] %v2076_v46 }
 0x17d   : > { %v2306_v1 = vpop.f32.mrb[4].mxu0 }
 0x17e   : > { %v1834_v6 = vmul.f32 %v2306_v1, %v4044_v33  ;;  %v1611_v50 = vpop.f32.mrb[5].mxu0 }
 0x17f   : > { %v1832_v12 = vmul.f32 %v4044_v33, %v1611_v50  ;;  %v2307_v25 = vpop.f32.mrb[6].mxu0 }
 0x180   : > { %v1873_v53 = vadd.f32 %v4049_v62, %v1834_v6  ;;  %v1835_v31 = vmul.f32 %v2307_v25, %v4044_v33  ;;  %v1614_v0 = vpop.f32.mrb[7].mxu0 }
 0x181   : > { %v1871_v8 = vadd.f32 %v4049_v62, %v1832_v12  ;;  %v1833_v58 = vmul.f32 %v4044_v33, %v1614_v0 }
 0x182   : > { %v1905_v45 = vsub.f32 0.0, %v1873_v53  ;;  %v1874_v11 = vadd.f32 %v4049_v62, %v1835_v31 }
 0x183   : > { %v1903_v2 = vsub.f32 0.0, %v1871_v8  ;;  %v4105_v26 = vadd.f32 %v4049_v62, %v1833_v58 }
 0x184   : > { %v1943_v27 = vmul.f32 1.442695, %v1905_v45  ;;  %v1906_v4 = vsub.f32 0.0, %v1874_v11 }
 0x185   : > { %v1939_v35 = vmul.f32 1.442695, %v1903_v2  ;;  %v1904_v20 = vsub.f32 0.0, %v4105_v26 }
 0x186   : > { %2541 = vpow2.f32 %v1943_v27  ;;  %v1945_v15 = vmul.f32 1.442695, %v1906_v4 }
 0x187   : > { %2543 = vpow2.f32 %v1939_v35  ;;  %v1941_v59 = vmul.f32 1.442695, %v1904_v20 }
 0x188   : > { %2545 = vpow2.f32 %v1945_v15 }
 0x189   : > { %2547 = vpow2.f32 %v1941_v59 }
 0x18c   : > { %v2322_v28 = vpop.f32.mrb[4].mxu1 }
 0x18d   : > { %v1850_v19 = vmul.f32 %v2322_v28, %v4044_v33  ;;  %v1675_v63 = vpop.f32.mrb[5].mxu1 }
 0x18e   : > { %v1848_v17 = vmul.f32 %v4044_v33, %v1675_v63  ;;  %v2323_v29 = vpop.f32.mrb[6].mxu1 }
 0x18f   : > { %v1889_v30 = vadd.f32 %v4049_v62, %v1850_v19  ;;  %v1851_v49 = vmul.f32 %v2323_v29, %v4044_v33  ;;  %v1678_v24 = vpop.f32.mrb[7].mxu1 }
 0x190   : > { %v2542_v42 = vpop.eup %2541  ;;  %v1887_v47 = vadd.f32 %v4049_v62, %v1848_v17  ;;  %v1849_v13 = vmul.f32 %v4044_v33, %v1678_v24 }
 0x191   : > { %v2544_v48 = vpop.eup %2543  ;;  %v2001_v51 = vadd.f32 1.0, %v2542_v42  ;;  %v1921_v43 = vsub.f32 0.0, %v1889_v30  ;;  %v1890_v16 = vadd.f32 %v4049_v62, %v1851_v49 }
 0x192   : > { %v2546_v41 = vpop.eup %2545  ;;  %v1999_v34 = vadd.f32 1.0, %v2544_v48  ;;  %v1919_v39 = vsub.f32 0.0, %v1887_v47  ;;  %v1888_v7 = vadd.f32 %v4049_v62, %v1849_v13 }
 0x193   : > { %v2548_v40 = vpop.eup %2547  ;;  %2549 = vrcp.f32 %v2001_v51  ;;  %v1975_v3 = vmul.f32 1.442695, %v1921_v43  ;;  %v2002_v32 = vadd.f32 1.0, %v2546_v41  ;;  %v1922_v23 = vsub.f32 0.0, %v1890_v16 }
 0x194   : > { %2551 = vrcp.f32 %v1999_v34  ;;  %v1971_v10 = vmul.f32 1.442695, %v1919_v39  ;;  %v1920_v5 = vsub.f32 0.0, %v1888_v7  ;;  %v2000_v44 = vadd.f32 1.0, %v2548_v40 }
 0x195   : > { %2553 = vpow2.f32 %v1975_v3  ;;  %v1977_v56 = vmul.f32 1.442695, %v1922_v23 }
 0x196   : > { %2555 = vpow2.f32 %v1971_v10  ;;  %v1973_v57 = vmul.f32 1.442695, %v1920_v5 }
 0x197   : > { %2557 = vrcp.f32 %v2002_v32 }
 0x198   : > { %2559 = vpow2.f32 %v1977_v56 }
 0x199   : > { %2561 = vrcp.f32 %v2000_v44 }
 0x19a   : > { %2563 = vpow2.f32 %v1973_v57 }
 0x19d   : > { %v2550_v52 = vpop.eup %2549 }
 0x19e   : > { %v2552_v37 = vpop.eup %2551  ;;  %v2065_v22 = vmul.f32 %v2550_v52, %v1873_v53 }
 0x19f   : > { %v2554_v14 = vpop.eup %2553  ;;  %v2063_v60 = vmul.f32 %v2552_v37, %v1871_v8 }
 0x1a0   : > { %v2556_v21 = vpop.eup %2555  ;;  %2097 = vst [vmem:[%s4083_s18 + $0x30] sm:$0xff] %v2065_v22  ;;  %v2017_v36 = vadd.f32 1.0, %v2554_v14 }
 0x1a1   : > { %v2558_v38 = vpop.eup %2557  ;;  %2095 = vst [vmem:[%s4083_s18 + $0x20] sm:$0xff] %v2063_v60  ;;  %v2015_v18 = vadd.f32 1.0, %v2556_v21 }
 0x1a2   : > { %v2560_v9 = vpop.eup %2559  ;;  %2565 = vrcp.f32 %v2017_v36  ;;  %v2066_v54 = vmul.f32 %v2558_v38, %v1874_v11 }
 0x1a3   : > { %v2562_v61 = vpop.eup %2561  ;;  %2567 = vrcp.f32 %v2015_v18  ;;  %v2018_v55 = vadd.f32 1.0, %v2560_v9 }
 0x1a4   : > { %v2564_v46 = vpop.eup %2563  ;;  %2098 = vst [vmem:[%s4083_s18 + $0x38] sm:$0xff] %v2066_v54  ;;  %v2064_v1 = vmul.f32 %v2562_v61, %v4105_v26 }
 0x1a5   : > { %2569 = vrcp.f32 %v2018_v55  ;;  %v2016_v6 = vadd.f32 1.0, %v2564_v46 }
 0x1a6   : > { %2096 = vst [vmem:[%s4083_s18 + $0x28] sm:$0xff] %v2064_v1 }
 0x1a7   : > { %2571 = vrcp.f32 %v2016_v6 }
 0x1ac   : > { %v2566_v50 = vpop.eup %2565 }
 0x1ad   : > { %v2568_v12 = vpop.eup %2567  ;;  %v2081_v25 = vmul.f32 %v2566_v50, %v1889_v30 }
 0x1ae   : > { %v2079_v53 = vmul.f32 %v2568_v12, %v1887_v47 }
 0x1af   : > { %v2570_v31 = vpop.eup %2569  ;;  %2113 = vst [vmem:[%s4083_s18 + $0xb0] sm:$0xff] %v2081_v25 }
 0x1b0   : > { %2111 = vst [vmem:[%s4083_s18 + $0xa0] sm:$0xff] %v2079_v53  ;;  %v2082_v0 = vmul.f32 %v2570_v31, %v1890_v16 }
 0x1b1   : > { %v2572_v8 = vpop.eup %2571 }
 0x1b2   : > { %2114 = vst [vmem:[%s4083_s18 + $0xb8] sm:$0xff] %v2082_v0  ;;  %v2080_v58 = vmul.f32 %v2572_v8, %v1888_v7 }
 0x1b4   : > { %2112 = vst [vmem:[%s4083_s18 + $0xa8] sm:$0xff] %v2080_v58 }
 0x1b8   : > { %v2310_v45 = vpop.f32.mrb[8].mxu0 }
 0x1b9   : > { %v1838_v11 = vmul.f32 %v2310_v45, %v4044_v33  ;;  %v1627_v2 = vpop.f32.mrb[9].mxu0 }
 0x1ba   : > { %v1836_v26 = vmul.f32 %v4044_v33, %v1627_v2  ;;  %v2311_v27 = vpop.f32.mrb[10].mxu0 }
 0x1bb   : > { %v1877_v4 = vadd.f32 %v4049_v62, %v1838_v11  ;;  %v1839_v35 = vmul.f32 %v2311_v27, %v4044_v33  ;;  %v1630_v20 = vpop.f32.mrb[11].mxu0 }
 0x1bc   : > { %v1875_v15 = vadd.f32 %v4049_v62, %v1836_v26  ;;  %v1837_v59 = vmul.f32 %v4044_v33, %v1630_v20 }
 0x1bd   : > { %v1909_v28 = vsub.f32 0.0, %v1877_v4  ;;  %v1878_v19 = vadd.f32 %v4049_v62, %v1839_v35 }
 0x1be   : > { %v1907_v63 = vsub.f32 0.0, %v1875_v15  ;;  %v4133_v17 = vadd.f32 %v4049_v62, %v1837_v59 }
 0x1bf   : > { %v1951_v29 = vmul.f32 1.442695, %v1909_v28  ;;  %v1910_v30 = vsub.f32 0.0, %v1878_v19 }
 0x1c0   : > { %v1947_v49 = vmul.f32 1.442695, %v1907_v63  ;;  %v1908_v24 = vsub.f32 0.0, %v4133_v17 }
 0x1c1   : > { %2573 = vpow2.f32 %v1951_v29  ;;  %v1953_v42 = vmul.f32 1.442695, %v1910_v30 }
 0x1c2   : > { %2575 = vpow2.f32 %v1947_v49  ;;  %v1949_v47 = vmul.f32 1.442695, %v1908_v24 }
 0x1c3   : > { %2577 = vpow2.f32 %v1953_v42 }
 0x1c4   : > { %2579 = vpow2.f32 %v1949_v47 }
 0x1c7   : > { %v2326_v13 = vpop.f32.mrb[8].mxu1 }
 0x1c8   : > { %v1854_v48 = vmul.f32 %v2326_v13, %v4044_v33  ;;  %v1691_v51 = vpop.f32.mrb[9].mxu1 }
 0x1c9   : > { %v1852_v43 = vmul.f32 %v4044_v33, %v1691_v51  ;;  %v2327_v16 = vpop.f32.mrb[10].mxu1 }
 0x1ca   : > { %v1893_v41 = vadd.f32 %v4049_v62, %v1854_v48  ;;  %v1855_v34 = vmul.f32 %v2327_v16, %v4044_v33  ;;  %v1694_v39 = vpop.f32.mrb[11].mxu1 }
 0x1cb   : > { %v2574_v7 = vpop.eup %2573  ;;  %v1891_v40 = vadd.f32 %v4049_v62, %v1852_v43  ;;  %v1853_v3 = vmul.f32 %v4044_v33, %v1694_v39 }
 0x1cc   : > { %v2576_v32 = vpop.eup %2575  ;;  %v2005_v23 = vadd.f32 1.0, %v2574_v7  ;;  %v1925_v10 = vsub.f32 0.0, %v1893_v41  ;;  %v1894_v5 = vadd.f32 %v4049_v62, %v1855_v34 }
 0x1cd   : > { %v2578_v56 = vpop.eup %2577  ;;  %v2003_v44 = vadd.f32 1.0, %v2576_v32  ;;  %v1923_v57 = vsub.f32 0.0, %v1891_v40  ;;  %v1892_v52 = vadd.f32 %v4049_v62, %v1853_v3 }
 0x1ce   : > { %v2580_v37 = vpop.eup %2579  ;;  %2581 = vrcp.f32 %v2005_v23  ;;  %v1983_v22 = vmul.f32 1.442695, %v1925_v10  ;;  %v2006_v14 = vadd.f32 1.0, %v2578_v56  ;;  %v1926_v60 = vsub.f32 0.0, %v1894_v5 }
 0x1cf   : > { %2583 = vrcp.f32 %v2003_v44  ;;  %v1979_v21 = vmul.f32 1.442695, %v1923_v57  ;;  %v1924_v36 = vsub.f32 0.0, %v1892_v52  ;;  %v2004_v18 = vadd.f32 1.0, %v2580_v37 }
 0x1d0   : > { %2585 = vpow2.f32 %v1983_v22  ;;  %v1985_v38 = vmul.f32 1.442695, %v1926_v60 }
 0x1d1   : > { %2587 = vpow2.f32 %v1979_v21  ;;  %v1981_v9 = vmul.f32 1.442695, %v1924_v36 }
 0x1d2   : > { %2589 = vrcp.f32 %v2006_v14 }
 0x1d3   : > { %2591 = vpow2.f32 %v1985_v38 }
 0x1d4   : > { %2593 = vrcp.f32 %v2004_v18 }
 0x1d5   : > { %2595 = vpow2.f32 %v1981_v9 }
 0x1d8   : > { %v2582_v54 = vpop.eup %2581 }
 0x1d9   : > { %v2584_v61 = vpop.eup %2583  ;;  %v2069_v55 = vmul.f32 %v2582_v54, %v1877_v4 }
 0x1da   : > { %v2586_v46 = vpop.eup %2585  ;;  %v2067_v1 = vmul.f32 %v2584_v61, %v1875_v15 }
 0x1db   : > { %v2588_v6 = vpop.eup %2587  ;;  %2101 = vst [vmem:[%s4083_s18 + $0x50] sm:$0xff] %v2069_v55  ;;  %v2021_v50 = vadd.f32 1.0, %v2586_v46 }
 0x1dc   : > { %v2590_v12 = vpop.eup %2589  ;;  %2099 = vst [vmem:[%s4083_s18 + $0x40] sm:$0xff] %v2067_v1  ;;  %v2019_v25 = vadd.f32 1.0, %v2588_v6 }
 0x1dd   : > { %v2592_v53 = vpop.eup %2591  ;;  %2597 = vrcp.f32 %v2021_v50  ;;  %v2070_v31 = vmul.f32 %v2590_v12, %v1878_v19 }
 0x1de   : > { %v2594_v0 = vpop.eup %2593  ;;  %2599 = vrcp.f32 %v2019_v25  ;;  %v2022_v8 = vadd.f32 1.0, %v2592_v53 }
 0x1df   : > { %v2596_v58 = vpop.eup %2595  ;;  %2102 = vst [vmem:[%s4083_s18 + $0x58] sm:$0xff] %v2070_v31  ;;  %v2068_v45 = vmul.f32 %v2594_v0, %v4133_v17 }
 0x1e0   : > { %2601 = vrcp.f32 %v2022_v8  ;;  %v2020_v11 = vadd.f32 1.0, %v2596_v58 }
 0x1e1   : > { %2100 = vst [vmem:[%s4083_s18 + $0x48] sm:$0xff] %v2068_v45 }
 0x1e2   : > { %2603 = vrcp.f32 %v2020_v11 }
 0x1e7   : > { %v2598_v2 = vpop.eup %2597 }
 0x1e8   : > { %v2600_v26 = vpop.eup %2599  ;;  %v2085_v27 = vmul.f32 %v2598_v2, %v1893_v41 }
 0x1e9   : > { %v2083_v4 = vmul.f32 %v2600_v26, %v1891_v40 }
 0x1ea   : > { %v2602_v35 = vpop.eup %2601  ;;  %2117 = vst [vmem:[%s4083_s18 + $0xd0] sm:$0xff] %v2085_v27 }
 0x1eb   : > { %2115 = vst [vmem:[%s4083_s18 + $0xc0] sm:$0xff] %v2083_v4  ;;  %v2086_v20 = vmul.f32 %v2602_v35, %v1894_v5 }
 0x1ec   : > { %v2604_v15 = vpop.eup %2603 }
 0x1ed   : > { %2118 = vst [vmem:[%s4083_s18 + $0xd8] sm:$0xff] %v2086_v20  ;;  %v2084_v59 = vmul.f32 %v2604_v15, %v1892_v52 }
 0x1ef   : > { %2116 = vst [vmem:[%s4083_s18 + $0xc8] sm:$0xff] %v2084_v59 }
 0x1f0   : > { %v2314_v28 = vpop.f32.mrb[12].mxu0 }
 0x1f1   : > { %v1842_v19 = vmul.f32 %v2314_v28, %v4044_v33  ;;  %v1643_v63 = vpop.f32.mrb[13].mxu0 }
 0x1f2   : > { %v1840_v17 = vmul.f32 %v4044_v33, %v1643_v63  ;;  %v2315_v29 = vpop.f32.mrb[14].mxu0 }
 0x1f3   : > { %v4156_v30 = vadd.f32 %v4049_v62, %v1842_v19  ;;  %v1843_v49 = vmul.f32 %v2315_v29, %v4044_v33  ;;  %v1646_v24 = vpop.f32.mrb[15].mxu0 }
 0x1f4   : > { %v4160_v42 = vadd.f32 %v4049_v62, %v1840_v17  ;;  %v1841_v47 = vmul.f32 %v4044_v33, %v1646_v24 }
 0x1f5   : > { %v1913_v13 = vsub.f32 0.0, %v4156_v30  ;;  %v4165_v48 = vadd.f32 %v4049_v62, %v1843_v49 }
 0x1f6   : > { %v1911_v51 = vsub.f32 0.0, %v4160_v42  ;;  %v4169_v43 = vadd.f32 %v4049_v62, %v1841_v47 }
 0x1f7   : > { %v1959_v16 = vmul.f32 1.442695, %v1913_v13  ;;  %v1914_v41 = vsub.f32 0.0, %v4165_v48 }
 0x1f8   : > { %v1955_v34 = vmul.f32 1.442695, %v1911_v51  ;;  %v1912_v39 = vsub.f32 0.0, %v4169_v43 }
 0x1f9   : > { %2605 = vpow2.f32 %v1959_v16  ;;  %v1961_v7 = vmul.f32 1.442695, %v1914_v41 }
 0x1fa   : > { %v2330_v40 = vpop.f32.mrb[12].mxu1  ;;  %2607 = vpow2.f32 %v1955_v34  ;;  %v1957_v3 = vmul.f32 1.442695, %v1912_v39 }
 0x1fb   : > { %v1858_v32 = vmul.f32 %v2330_v40, %v4044_v33  ;;  %v1707_v23 = vpop.f32.mrb[13].mxu1  ;;  %2609 = vpow2.f32 %v1961_v7 }
 0x1fc   : > { %v1856_v10 = vmul.f32 %v4044_v33, %v1707_v23  ;;  %v2331_v5 = vpop.f32.mrb[14].mxu1  ;;  %2611 = vpow2.f32 %v1957_v3 }
 0x1fd   : > { %v1897_v56 = vadd.f32 %v4049_v62, %v1858_v32  ;;  %v1859_v44 = vmul.f32 %v2331_v5, %v4044_v33  ;;  %v1710_v57 = vpop.f32.mrb[15].mxu1 }
 0x1fe   : > { %v1895_v52 = vadd.f32 %v4049_v62, %v1856_v10  ;;  %v1857_v37 = vmul.f32 %v4044_v33, %v1710_v57 }
 0x1ff   : > { %v1929_v22 = vsub.f32 0.0, %v1897_v56  ;;  %v1898_v14 = vadd.f32 %v4049_v62, %v1859_v44 }
 0x200   : > { %v1927_v60 = vsub.f32 0.0, %v1895_v52  ;;  %v1896_v21 = vadd.f32 %v4049_v62, %v1857_v37 }
 0x201   : > { %v1991_v36 = vmul.f32 1.442695, %v1929_v22  ;;  %v1930_v38 = vsub.f32 0.0, %v1898_v14 }
 0x202   : > { %v1987_v18 = vmul.f32 1.442695, %v1927_v60  ;;  %v1928_v9 = vsub.f32 0.0, %v1896_v21 }
 0x203   : > { %v2606_v54 = vpop.eup %2605  ;;  %2613 = vpow2.f32 %v1991_v36  ;;  %v1993_v61 = vmul.f32 1.442695, %v1930_v38 }
 0x204   : > { %v2608_v55 = vpop.eup %2607  ;;  %v2009_v46 = vadd.f32 1.0, %v2606_v54  ;;  %2615 = vpow2.f32 %v1987_v18  ;;  %v1989_v12 = vmul.f32 1.442695, %v1928_v9 }
 0x205   : > { %v2610_v1 = vpop.eup %2609  ;;  %v2007_v6 = vadd.f32 1.0, %v2608_v55  ;;  %2617 = vpow2.f32 %v1993_v61 }
 0x206   : > { %v2612_v33 = vpop.eup %2611  ;;  %2619 = vrcp.f32 %v2009_v46  ;;  %v2010_v50 = vadd.f32 1.0, %v2610_v1 }
 0x207   : > { %2621 = vrcp.f32 %v2007_v6  ;;  %v2008_v25 = vadd.f32 1.0, %v2612_v33 }
 0x208   : > { %2623 = vrcp.f32 %v2010_v50 }
 0x209   : > { %2625 = vrcp.f32 %v2008_v25 }
 0x20a   : > { %2627 = vpow2.f32 %v1989_v12 }
 0x20d   : > { %v2614_v62 = vpop.eup %2613 }
 0x20e   : > { %v2616_v53 = vpop.eup %2615  ;;  %v2025_v31 = vadd.f32 1.0, %v2614_v62 }
 0x20f   : > { %v2618_v0 = vpop.eup %2617  ;;  %v2023_v8 = vadd.f32 1.0, %v2616_v53 }
 0x210   : > { %v2620_v58 = vpop.eup %2619  ;;  %2629 = vrcp.f32 %v2025_v31  ;;  %v2026_v45 = vadd.f32 1.0, %v2618_v0 }
 0x211   : > { %v2622_v11 = vpop.eup %2621  ;;  %v2073_v2 = vmul.f32 %v2620_v58, %v4156_v30  ;;  %2631 = vrcp.f32 %v2023_v8 }
 0x212   : > { %v2624_v26 = vpop.eup %2623  ;;  %v2071_v27 = vmul.f32 %v2622_v11, %v4160_v42  ;;  %2633 = vrcp.f32 %v2026_v45 }
 0x213   : > { %v2626_v4 = vpop.eup %2625  ;;  %2105 = vst [vmem:[%s4083_s18 + $0x70] sm:$0xff] %v2073_v2  ;;  %v2074_v35 = vmul.f32 %v2624_v26, %v4165_v48 }
 0x214   : > { %v2628_v20 = vpop.eup %2627  ;;  %2103 = vst [vmem:[%s4083_s18 + $0x60] sm:$0xff] %v2071_v27  ;;  %v2072_v15 = vmul.f32 %v2626_v4, %v4169_v43 }
 0x215   : > { %2106 = vst [vmem:[%s4083_s18 + $0x78] sm:$0xff] %v2074_v35  ;;  %v2024_v59 = vadd.f32 1.0, %v2628_v20 }
 0x216   : > { %2104 = vst [vmem:[%s4083_s18 + $0x68] sm:$0xff] %v2072_v15 }
 0x217   : > { %2635 = vrcp.f32 %v2024_v59 }
 0x21a   : > { %v2630_v28 = vpop.eup %2629 }
 0x21b   : > { %v2632_v19 = vpop.eup %2631  ;;  %v2089_v63 = vmul.f32 %v2630_v28, %v1897_v56 }
 0x21c   : > { %v2634_v17 = vpop.eup %2633  ;;  %v2087_v29 = vmul.f32 %v2632_v19, %v1895_v52 }
 0x21d   : > { %2121 = vst [vmem:[%s4083_s18 + $0xf0] sm:$0xff] %v2089_v63  ;;  %v2090_v30 = vmul.f32 %v2634_v17, %v1898_v14 }
 0x21e   : > { %2119 = vst [vmem:[%s4083_s18 + $0xe0] sm:$0xff] %v2087_v29 }
 0x21f   : > { %2122 = vst [vmem:[%s4083_s18 + $0xf8] sm:$0xff] %v2090_v30 }
 0x221   : > { %v2636_v49 = vpop.eup %2635 }
 0x222   : > { %v2088_v24 = vmul.f32 %v2636_v49, %v1896_v21 }
 0x224   : > { %2120 = vst [vmem:[%s4083_s18 + $0xe8] sm:$0xff] %v2088_v24 }
 0x225 PF: > { %s16_s23 = sadd.s32 1, %s2664_s23   ;;  %s4281_s21 = smov %s2660_s22 }
 0x226   : > { %p13_p5 = scmp.ge.s32.totalorder %s16_s23, 4   ;;  %s4282_s22 = smov %s4284_s24 }
 0x228   :  { %15 = sbr.rel (!%p13_p5) target bundleno = 2 (0x2), region = 91 }

</bundles_post_ra>
